<compile_context>
chip_gen: v7x
topology: tpu7x:2x2x1
jax: 0.10.0
libtpu: 0.0.40
codegen_flags: <defaults>
</compile_context>

<pallas_src>
import functools

import jax
import jax.numpy as jnp
from jax.experimental import pallas as pl
from jax.experimental.pallas import tpu as pltpu


# ----------------------------------------------------------------------------
# Fused kernel: all LSTM layers over all timesteps + the Linear head.
# ----------------------------------------------------------------------------
def _fused_rnn_kernel(xp_ref, w_ih_ref, w_hh_ref, b_rest_ref, h0_ref, c0_ref,
                      w_lin_ref, b_lin_ref,
                      out_ref, hT_ref, cT_ref, y_sc, xp_sc):
    # Shapes (all static):
    #   xp_ref:     (S, Bp, 4H)   layer-0 input projection, layer-0 bias already folded in
    #   w_ih_ref:   (max(L-1,1), H, 4H)
    #   w_hh_ref:   (L, H, 4H)
    #   b_rest_ref: (max(L-1,1), 1, 4H)   biases for layers 1..L-1
    #   h0/c0:      (L, Bp, H)
    #   w_lin_ref:  (H, Op), b_lin_ref: (1, Op)   Op = head dim padded to 128
    #   out_ref:    (S*Bp, Op), hT/cT: (L, Bp, H)
    #   y_sc:       (S*Bp, H)  VMEM scratch: current layer's outputs
    #   xp_sc:      (S*Bp, 4H) VMEM scratch: bulk input projection for layers >= 1
    S, Bp, _ = xp_ref.shape
    L = w_hh_ref.shape[0]
    H = w_hh_ref.shape[1]

    def lstm_cell(pre, c_prev):
        # PyTorch gate order: input, forget, cell(g), output
        i_g = jax.nn.sigmoid(pre[:, 0 * H:1 * H])
        f_g = jax.nn.sigmoid(pre[:, 1 * H:2 * H])
        g_g = jnp.tanh(pre[:, 2 * H:3 * H])
        o_g = jax.nn.sigmoid(pre[:, 3 * H:4 * H])
        c_new = f_g * c_prev + i_g * g_g
        h_new = o_g * jnp.tanh(c_new)
        return h_new, c_new

    # ---- layer 0: input projection (with bias) precomputed as an embedding gather ----
    def step0(t, carry):
        h, c = carry
        pre = xp_ref[t] + jnp.dot(h, w_hh_ref[0],
                                  preferred_element_type=jnp.float32)
        h_new, c_new = lstm_cell(pre, c)
        row = pl.multiple_of(t * Bp, Bp)
        y_sc[pl.ds(row, Bp), :] = h_new
        return (h_new, c_new)

    h_fin, c_fin = jax.lax.fori_loop(0, S, step0, (h0_ref[0], c0_ref[0]),
                                     unroll=True)
    hT_ref[0] = h_fin
    cT_ref[0] = c_fin

    # ---- layers 1 .. L-1 ----
    for layer in range(1, L):
        # Bulk input projection for the whole layer (one well-shaped GEMM), bias folded.
        # This removes one matmul + one add from every step's serial dependency chain.
        xp_sc[...] = (jnp.dot(y_sc[...], w_ih_ref[layer - 1],
                              preferred_element_type=jnp.float32)
                      + b_rest_ref[layer - 1])

        def stepl(t, carry, layer=layer):
            h, c = carry
            row = pl.multiple_of(t * Bp, Bp)
            pre = (xp_sc[pl.ds(row, Bp), :]
                   + jnp.dot(h, w_hh_ref[layer],
                             preferred_element_type=jnp.float32))
            h_new, c_new = lstm_cell(pre, c)
            y_sc[pl.ds(row, Bp), :] = h_new
            return (h_new, c_new)

        h_fin, c_fin = jax.lax.fori_loop(0, S, stepl,
                                         (h0_ref[layer], c0_ref[layer]),
                                         unroll=True)
        hT_ref[layer] = h_fin
        cT_ref[layer] = c_fin

    # ---- linear head on the VMEM-resident Y slab, single lane-dense bulk writeback ----
    out_ref[...] = (jnp.dot(y_sc[...], w_lin_ref[...],
                            preferred_element_type=jnp.float32)
                    + b_lin_ref[...])


# ----------------------------------------------------------------------------
# Full module forward (glue in plain JAX, everything hot inside one Pallas call)
# ----------------------------------------------------------------------------
@functools.partial(jax.jit, static_argnames=("input_size",))
def rnn_forward(params, x, state, *, input_size):
    h0, c0 = state                                 # each (L, B, H)
    L, B, H = h0.shape
    S = x.shape[1]
    O = input_size
    Bp = max(8, ((B + 7) // 8) * 8)                # pad batch to full sublanes
    Op = ((O + 127) // 128) * 128                  # lane-dense head output width

    # layer-0 input projection: one_hot(x) @ W_ih^T == row gather of W_ih^T.
    # Layer-0 bias folded in here (removed from the per-step chain).
    xp = jnp.take(params["w_ih0_t"], x.T, axis=0) + params["b"][0]   # (S, B, 4H)

    pad = Bp - B
    xp = jnp.pad(xp, ((0, 0), (0, pad), (0, 0)))
    h0p = jnp.pad(h0, ((0, 0), (0, pad), (0, 0)))
    c0p = jnp.pad(c0, ((0, 0), (0, pad), (0, 0)))

    w_ih_rest = params["w_ih_rest"]                # (max(L-1,1), H, 4H)
    w_hh = params["w_hh"]                          # (L, H, 4H)
    if L > 1:
        b_rest = params["b"][1:]                   # (L-1, 1, 4H)
    else:
        b_rest = jnp.zeros((1, 1, 4 * H), jnp.float32)   # unused dummy for L==1
    # pad the head to a multiple of 128 lanes (unmasked vst writeback)
    w_lin_t = jnp.pad(params["lin_w_t"], ((0, 0), (0, Op - O)))   # (H, Op)
    b_lin = jnp.pad(params["lin_b"], ((0, 0), (0, Op - O)))       # (1, Op)

    out_p, hTp, cTp = pl.pallas_call(
        _fused_rnn_kernel,
        out_shape=(jax.ShapeDtypeStruct((S * Bp, Op), jnp.float32),
                   jax.ShapeDtypeStruct((L, Bp, H), jnp.float32),
                   jax.ShapeDtypeStruct((L, Bp, H), jnp.float32)),
        grid_spec=pltpu.PrefetchScalarGridSpec(
            num_scalar_prefetch=0,
            grid=(1,),
            in_specs=[
                pl.BlockSpec((S, Bp, 4 * H), lambda i: (0, 0, 0)),
                pl.BlockSpec(w_ih_rest.shape, lambda i: (0, 0, 0)),
                pl.BlockSpec(w_hh.shape, lambda i: (0, 0, 0)),
                pl.BlockSpec(b_rest.shape, lambda i: (0, 0, 0)),
                pl.BlockSpec((L, Bp, H), lambda i: (0, 0, 0)),
                pl.BlockSpec((L, Bp, H), lambda i: (0, 0, 0)),
                pl.BlockSpec((H, Op), lambda i: (0, 0)),
                pl.BlockSpec((1, Op), lambda i: (0, 0)),
            ],
            out_specs=[
                pl.BlockSpec((S * Bp, Op), lambda i: (0, 0)),
                pl.BlockSpec((L, Bp, H), lambda i: (0, 0, 0)),
                pl.BlockSpec((L, Bp, H), lambda i: (0, 0, 0)),
            ],
            scratch_shapes=[pltpu.VMEM((S * Bp, H), jnp.float32),
                            pltpu.VMEM((S * Bp, 4 * H), jnp.float32)],
        ),
        compiler_params=pltpu.CompilerParams(
            dimension_semantics=("arbitrary",),
            vmem_limit_bytes=64 * 1024 * 1024),
    )(xp, w_ih_rest, w_hh, b_rest, h0p, c0p, w_lin_t, b_lin)

    hT = hTp[:, :B, :]
    cT = cTp[:, :B, :]
    out = out_p.reshape(S, Bp, Op)[:, :B, :O].reshape(S * B, O)
    return out, (hT, cT)


# ----------------------------------------------------------------------------
# Pure-JAX reference (correctness sanity check)
# ----------------------------------------------------------------------------
def rnn_forward_ref(params, x, state, *, input_size):
    h0, c0 = state
    L, B, H = h0.shape
    hp = jax.lax.Precision.HIGHEST
    X = jax.nn.one_hot(x.T, input_size, dtype=jnp.float32)   # (S, B, I)
    inp = X
    hs, cs = [], []
    for layer in range(L):
        w_ih_t = params["w_ih0_t"] if layer == 0 else params["w_ih_rest"][layer - 1]
        w_hh_t = params["w_hh"][layer]
        b = params["b"][layer]

        def step(carry, xt, w_ih_t=w_ih_t, w_hh_t=w_hh_t, b=b):
            h, c = carry
            gates = (jnp.dot(xt, w_ih_t, precision=hp)
                     + jnp.dot(h, w_hh_t, precision=hp) + b)
            i = jax.nn.sigmoid(gates[:, 0 * H:1 * H])
            f = jax.nn.sigmoid(gates[:, 1 * H:2 * H])
            g = jnp.tanh(gates[:, 2 * H:3 * H])
            o = jax.nn.sigmoid(gates[:, 3 * H:4 * H])
            c = f * c + i * g
            h = o * jnp.tanh(c)
            return (h, c), h

        (hT, cT), y = jax.lax.scan(step, (h0[layer], c0[layer]), inp)
        hs.append(hT)
        cs.append(cT)
        inp = y
    Y = inp
    out = jnp.dot(Y.reshape(-1, H), params["lin_w_t"], precision=hp) + params["lin_b"]
    return out, (jnp.stack(hs), jnp.stack(cs))


# ----------------------------------------------------------------------------
# Deterministic parameter init (matches torch.nn.LSTM / Linear shapes)
# ----------------------------------------------------------------------------
def init_params(key, input_size, hidden_size, num_layer):
    H = hidden_size
    bound = 1.0 / (H ** 0.5)

    def unif(k, shape):
        return jax.random.uniform(k, shape, jnp.float32, -bound, bound)

    w_ih0_t = None
    w_ih_rest, w_hh_all, b_all = [], [], []
    for layer in range(num_layer):
        in_feat = input_size if layer == 0 else H
        key, k1, k2, k3, k4 = jax.random.split(key, 5)
        w_ih = unif(k1, (4 * H, in_feat))
        w_hh = unif(k2, (4 * H, H))
        b_ih = unif(k3, (4 * H,))
        b_hh = unif(k4, (4 * H,))
        if layer == 0:
            w_ih0_t = w_ih.T                           # (input_size, 4H)
        else:
            w_ih_rest.append(w_ih.T)                   # (H, 4H)
        w_hh_all.append(w_hh.T)                        # (H, 4H)
        b_all.append((b_ih + b_hh)[None, :])           # (1, 4H)

    if w_ih_rest:
        w_ih_rest_arr = jnp.stack(w_ih_rest)           # (L-1, H, 4H)
    else:
        w_ih_rest_arr = jnp.zeros((1, H, 4 * H), jnp.float32)  # unused dummy for L==1

    key, k5, k6 = jax.random.split(key, 3)
    lin_w = unif(k5, (input_size, H))
    lin_b = unif(k6, (input_size,))
    return {
        "w_ih0_t": w_ih0_t,                            # (input_size, 4H)
        "w_ih_rest": w_ih_rest_arr,                    # (max(L-1,1), H, 4H)
        "w_hh": jnp.stack(w_hh_all),                   # (L, H, 4H)
        "b": jnp.stack(b_all),                         # (L, 1, 4H)
        "lin_w_t": lin_w.T,                            # (H, input_size)
        "lin_b": lin_b[None, :],                       # (1, input_size)
    }


if __name__ == "__main__":
    input_size = 16     # vocab / one-hot width == output size
    hidden_size = 32
    num_layer = 2
    batch = 2
    seq = 8

    key = jax.random.PRNGKey(0)
    kp, kx = jax.random.split(key)
    params = init_params(kp, input_size, hidden_size, num_layer)

    x = jax.random.randint(kx, (batch, seq), 0, input_size, dtype=jnp.int32)
    state = (jnp.zeros((num_layer, batch, hidden_size), jnp.float32),
             jnp.zeros((num_layer, batch, hidden_size), jnp.float32))

    out, (hT, cT) = rnn_forward(params, x, state, input_size=input_size)
    jax.block_until_ready((out, hT, cT))

    out_r, (hT_r, cT_r) = rnn_forward_ref(params, x, state, input_size=input_size)
    assert out.shape == (seq * batch, input_size)
    assert hT.shape == (num_layer, batch, hidden_size)
    assert cT.shape == (num_layer, batch, hidden_size)
    assert jnp.allclose(out, out_r, atol=1e-3, rtol=1e-3)
    assert jnp.allclose(hT, hT_r, atol=1e-3, rtol=1e-3)
    assert jnp.allclose(cT, cT_r, atol=1e-3, rtol=1e-3)

    print("KERNEL_OK")
</pallas_src>

<mosaic_0001>
module attributes {stable_mosaic.version = 11 : i64} {
  func.func @_fused_rnn_kernel(%arg0: i32, %arg1: memref<8x8x128xf32, #tpu.memory_space<vmem>>, %arg2: memref<1x32x128xf32, #tpu.memory_space<vmem>>, %arg3: memref<2x32x128xf32, #tpu.memory_space<vmem>>, %arg4: memref<1x1x128xf32, #tpu.memory_space<vmem>>, %arg5: memref<2x8x32xf32, #tpu.memory_space<vmem>>, %arg6: memref<2x8x32xf32, #tpu.memory_space<vmem>>, %arg7: memref<32x128xf32, #tpu.memory_space<vmem>>, %arg8: memref<1x128xf32, #tpu.memory_space<vmem>>, %arg9: memref<64x128xf32, #tpu.memory_space<vmem>>, %arg10: memref<2x8x32xf32, #tpu.memory_space<vmem>>, %arg11: memref<2x8x32xf32, #tpu.memory_space<vmem>>, %arg12: memref<64x32xf32, #tpu.memory_space<vmem>>, %arg13: memref<64x128xf32, #tpu.memory_space<vmem>>) attributes {dimension_semantics = [#tpu.dimension_semantics<arbitrary>], iteration_bounds = array<i64: 1>, scalar_prefetch = 0 : i64, scratch_operands = 2 : i64, tpu.core_type = #tpu.core_type<tc>, window_params = [{pipeline_mode = #tpu.pipeline_mode<synchronous>, transform_indices = @transform_0, window_bounds = array<i64: 8, 8, 128>}, {pipeline_mode = #tpu.pipeline_mode<synchronous>, transform_indices = @transform_1, window_bounds = array<i64: 1, 32, 128>}, {pipeline_mode = #tpu.pipeline_mode<synchronous>, transform_indices = @transform_2, window_bounds = array<i64: 2, 32, 128>}, {pipeline_mode = #tpu.pipeline_mode<synchronous>, transform_indices = @transform_3, window_bounds = array<i64: 1, 1, 128>}, {pipeline_mode = #tpu.pipeline_mode<synchronous>, transform_indices = @transform_4, window_bounds = array<i64: 2, 8, 32>}, {pipeline_mode = #tpu.pipeline_mode<synchronous>, transform_indices = @transform_5, window_bounds = array<i64: 2, 8, 32>}, {pipeline_mode = #tpu.pipeline_mode<synchronous>, transform_indices = @transform_6, window_bounds = array<i64: 32, 128>}, {pipeline_mode = #tpu.pipeline_mode<synchronous>, transform_indices = @transform_7, window_bounds = array<i64: 1, 128>}, {pipeline_mode = #tpu.pipeline_mode<synchronous>, transform_indices = @transform_8, window_bounds = array<i64: 64, 128>}, {pipeline_mode = #tpu.pipeline_mode<synchronous>, transform_indices = @transform_9, window_bounds = array<i64: 2, 8, 32>}, {pipeline_mode = #tpu.pipeline_mode<synchronous>, transform_indices = @transform_10, window_bounds = array<i64: 2, 8, 32>}]} {
    %c0 = arith.constant 0 : index
    %c0_0 = arith.constant 0 : index
    %c0_1 = arith.constant 0 : index
    %0 = vector.load %arg5[%c0, %c0_0, %c0_1] : memref<2x8x32xf32, #tpu.memory_space<vmem>>, vector<1x8x32xf32>
    %1 = vector.shape_cast %0 : vector<1x8x32xf32> to vector<8x32xf32>
    %c0_2 = arith.constant 0 : index
    %c0_3 = arith.constant 0 : index
    %c0_4 = arith.constant 0 : index
    %2 = vector.load %arg6[%c0_2, %c0_3, %c0_4] : memref<2x8x32xf32, #tpu.memory_space<vmem>>, vector<1x8x32xf32>
    %3 = vector.shape_cast %2 : vector<1x8x32xf32> to vector<8x32xf32>
    %c0_i32 = arith.constant 0 : i32
    %4 = arith.index_cast %c0_i32 : i32 to index
    %c0_5 = arith.constant 0 : index
    %c0_6 = arith.constant 0 : index
    %5 = vector.load %arg1[%4, %c0_5, %c0_6] : memref<8x8x128xf32, #tpu.memory_space<vmem>>, vector<1x8x128xf32>
    %6 = vector.shape_cast %5 : vector<1x8x128xf32> to vector<8x128xf32>
    %c0_7 = arith.constant 0 : index
    %c0_8 = arith.constant 0 : index
    %c0_9 = arith.constant 0 : index
    %7 = vector.load %arg3[%c0_7, %c0_8, %c0_9] : memref<2x32x128xf32, #tpu.memory_space<vmem>>, vector<1x32x128xf32>
    %8 = vector.shape_cast %7 : vector<1x32x128xf32> to vector<32x128xf32>
    %cst = arith.constant dense<0.000000e+00> : vector<8x128xf32>
    %9 = tpu.matmul %1, %8, %cst {dimension_numbers = #tpu.dot_dimension_numbers<[1], [0], [0], [1], [0, 0, 1, 1], [], []>} : vector<8x32xf32>, vector<32x128xf32>, vector<8x128xf32> -> vector<8x128xf32>
    %10 = arith.addf %6, %9 : vector<8x128xf32>
    %11 = vector.extract_strided_slice %10 {offsets = [0, 0], sizes = [8, 32], strides = [1, 1]} : vector<8x128xf32> to vector<8x32xf32>
    %12 = arith.negf %11 : vector<8x32xf32>
    %13 = math.exp %12 : vector<8x32xf32>
    %cst_10 = arith.constant 1.000000e+00 : f32
    %14 = vector.broadcast %cst_10 : f32 to vector<8x32xf32>
    %15 = arith.addf %14, %13 : vector<8x32xf32>
    %16 = arith.divf %14, %15 : vector<8x32xf32>
    %17 = vector.extract_strided_slice %10 {offsets = [0, 32], sizes = [8, 32], strides = [1, 1]} : vector<8x128xf32> to vector<8x32xf32>
    %18 = arith.negf %17 : vector<8x32xf32>
    %19 = math.exp %18 : vector<8x32xf32>
    %cst_11 = arith.constant 1.000000e+00 : f32
    %20 = vector.broadcast %cst_11 : f32 to vector<8x32xf32>
    %21 = arith.addf %20, %19 : vector<8x32xf32>
    %22 = arith.divf %20, %21 : vector<8x32xf32>
    %23 = vector.extract_strided_slice %10 {offsets = [0, 64], sizes = [8, 32], strides = [1, 1]} : vector<8x128xf32> to vector<8x32xf32>
    %24 = math.tanh %23 : vector<8x32xf32>
    %25 = vector.extract_strided_slice %10 {offsets = [0, 96], sizes = [8, 32], strides = [1, 1]} : vector<8x128xf32> to vector<8x32xf32>
    %26 = arith.negf %25 : vector<8x32xf32>
    %27 = math.exp %26 : vector<8x32xf32>
    %cst_12 = arith.constant 1.000000e+00 : f32
    %28 = vector.broadcast %cst_12 : f32 to vector<8x32xf32>
    %29 = arith.addf %28, %27 : vector<8x32xf32>
    %30 = arith.divf %28, %29 : vector<8x32xf32>
    %31 = arith.mulf %22, %3 : vector<8x32xf32>
    %32 = arith.mulf %16, %24 : vector<8x32xf32>
    %33 = arith.addf %31, %32 : vector<8x32xf32>
    %34 = math.tanh %33 : vector<8x32xf32>
    %35 = arith.mulf %30, %34 : vector<8x32xf32>
    %c8_i32 = arith.constant 8 : i32
    %36 = arith.muli %c0_i32, %c8_i32 : i32
    %37 = tpu.assume_multiple %36, 8 : i32
    %38 = arith.index_cast %37 : i32 to index
    %c0_13 = arith.constant 0 : index
    %39 = vector.load %arg12[%38, %c0_13] : memref<64x32xf32, #tpu.memory_space<vmem>>, vector<8x32xf32>
    tpu.vector_store %arg12[%38, %c0_13], %35 {strides = array<i32>} : memref<64x32xf32, #tpu.memory_space<vmem>>, vector<8x32xf32>,
    %c1_i32 = arith.constant 1 : i32
    %40 = arith.index_cast %c1_i32 : i32 to index
    %c0_14 = arith.constant 0 : index
    %c0_15 = arith.constant 0 : index
    %41 = vector.load %arg1[%40, %c0_14, %c0_15] : memref<8x8x128xf32, #tpu.memory_space<vmem>>, vector<1x8x128xf32>
    %42 = vector.shape_cast %41 : vector<1x8x128xf32> to vector<8x128xf32>
    %c0_16 = arith.constant 0 : index
    %c0_17 = arith.constant 0 : index
    %c0_18 = arith.constant 0 : index
    %43 = vector.load %arg3[%c0_16, %c0_17, %c0_18] : memref<2x32x128xf32, #tpu.memory_space<vmem>>, vector<1x32x128xf32>
    %44 = vector.shape_cast %43 : vector<1x32x128xf32> to vector<32x128xf32>
    %cst_19 = arith.constant dense<0.000000e+00> : vector<8x128xf32>
    %45 = tpu.matmul %35, %44, %cst_19 {dimension_numbers = #tpu.dot_dimension_numbers<[1], [0], [0], [1], [0, 0, 1, 1], [], []>} : vector<8x32xf32>, vector<32x128xf32>, vector<8x128xf32> -> vector<8x128xf32>
    %46 = arith.addf %42, %45 : vector<8x128xf32>
    %47 = vector.extract_strided_slice %46 {offsets = [0, 0], sizes = [8, 32], strides = [1, 1]} : vector<8x128xf32> to vector<8x32xf32>
    %48 = arith.negf %47 : vector<8x32xf32>
    %49 = math.exp %48 : vector<8x32xf32>
    %cst_20 = arith.constant 1.000000e+00 : f32
    %50 = vector.broadcast %cst_20 : f32 to vector<8x32xf32>
    %51 = arith.addf %50, %49 : vector<8x32xf32>
    %52 = arith.divf %50, %51 : vector<8x32xf32>
    %53 = vector.extract_strided_slice %46 {offsets = [0, 32], sizes = [8, 32], strides = [1, 1]} : vector<8x128xf32> to vector<8x32xf32>
    %54 = arith.negf %53 : vector<8x32xf32>
    %55 = math.exp %54 : vector<8x32xf32>
    %cst_21 = arith.constant 1.000000e+00 : f32
    %56 = vector.broadcast %cst_21 : f32 to vector<8x32xf32>
    %57 = arith.addf %56, %55 : vector<8x32xf32>
    %58 = arith.divf %56, %57 : vector<8x32xf32>
    %59 = vector.extract_strided_slice %46 {offsets = [0, 64], sizes = [8, 32], strides = [1, 1]} : vector<8x128xf32> to vector<8x32xf32>
    %60 = math.tanh %59 : vector<8x32xf32>
    %61 = vector.extract_strided_slice %46 {offsets = [0, 96], sizes = [8, 32], strides = [1, 1]} : vector<8x128xf32> to vector<8x32xf32>
    %62 = arith.negf %61 : vector<8x32xf32>
    %63 = math.exp %62 : vector<8x32xf32>
    %cst_22 = arith.constant 1.000000e+00 : f32
    %64 = vector.broadcast %cst_22 : f32 to vector<8x32xf32>
    %65 = arith.addf %64, %63 : vector<8x32xf32>
    %66 = arith.divf %64, %65 : vector<8x32xf32>
    %67 = arith.mulf %58, %33 : vector<8x32xf32>
    %68 = arith.mulf %52, %60 : vector<8x32xf32>
    %69 = arith.addf %67, %68 : vector<8x32xf32>
    %70 = math.tanh %69 : vector<8x32xf32>
    %71 = arith.mulf %66, %70 : vector<8x32xf32>
    %c8_i32_23 = arith.constant 8 : i32
    %72 = arith.muli %c1_i32, %c8_i32_23 : i32
    %73 = tpu.assume_multiple %72, 8 : i32
    %74 = arith.index_cast %73 : i32 to index
    %c0_24 = arith.constant 0 : index
    %75 = vector.load %arg12[%74, %c0_24] : memref<64x32xf32, #tpu.memory_space<vmem>>, vector<8x32xf32>
    tpu.vector_store %arg12[%74, %c0_24], %71 {strides = array<i32>} : memref<64x32xf32, #tpu.memory_space<vmem>>, vector<8x32xf32>,
    %c2_i32 = arith.constant 2 : i32
    %76 = arith.index_cast %c2_i32 : i32 to index
    %c0_25 = arith.constant 0 : index
    %c0_26 = arith.constant 0 : index
    %77 = vector.load %arg1[%76, %c0_25, %c0_26] : memref<8x8x128xf32, #tpu.memory_space<vmem>>, vector<1x8x128xf32>
    %78 = vector.shape_cast %77 : vector<1x8x128xf32> to vector<8x128xf32>
    %c0_27 = arith.constant 0 : index
    %c0_28 = arith.constant 0 : index
    %c0_29 = arith.constant 0 : index
    %79 = vector.load %arg3[%c0_27, %c0_28, %c0_29] : memref<2x32x128xf32, #tpu.memory_space<vmem>>, vector<1x32x128xf32>
    %80 = vector.shape_cast %79 : vector<1x32x128xf32> to vector<32x128xf32>
    %cst_30 = arith.constant dense<0.000000e+00> : vector<8x128xf32>
    %81 = tpu.matmul %71, %80, %cst_30 {dimension_numbers = #tpu.dot_dimension_numbers<[1], [0], [0], [1], [0, 0, 1, 1], [], []>} : vector<8x32xf32>, vector<32x128xf32>, vector<8x128xf32> -> vector<8x128xf32>
    %82 = arith.addf %78, %81 : vector<8x128xf32>
    %83 = vector.extract_strided_slice %82 {offsets = [0, 0], sizes = [8, 32], strides = [1, 1]} : vector<8x128xf32> to vector<8x32xf32>
    %84 = arith.negf %83 : vector<8x32xf32>
    %85 = math.exp %84 : vector<8x32xf32>
    %cst_31 = arith.constant 1.000000e+00 : f32
    %86 = vector.broadcast %cst_31 : f32 to vector<8x32xf32>
    %87 = arith.addf %86, %85 : vector<8x32xf32>
    %88 = arith.divf %86, %87 : vector<8x32xf32>
    %89 = vector.extract_strided_slice %82 {offsets = [0, 32], sizes = [8, 32], strides = [1, 1]} : vector<8x128xf32> to vector<8x32xf32>
    %90 = arith.negf %89 : vector<8x32xf32>
    %91 = math.exp %90 : vector<8x32xf32>
    %cst_32 = arith.constant 1.000000e+00 : f32
    %92 = vector.broadcast %cst_32 : f32 to vector<8x32xf32>
    %93 = arith.addf %92, %91 : vector<8x32xf32>
    %94 = arith.divf %92, %93 : vector<8x32xf32>
    %95 = vector.extract_strided_slice %82 {offsets = [0, 64], sizes = [8, 32], strides = [1, 1]} : vector<8x128xf32> to vector<8x32xf32>
    %96 = math.tanh %95 : vector<8x32xf32>
    %97 = vector.extract_strided_slice %82 {offsets = [0, 96], sizes = [8, 32], strides = [1, 1]} : vector<8x128xf32> to vector<8x32xf32>
    %98 = arith.negf %97 : vector<8x32xf32>
    %99 = math.exp %98 : vector<8x32xf32>
    %cst_33 = arith.constant 1.000000e+00 : f32
    %100 = vector.broadcast %cst_33 : f32 to vector<8x32xf32>
    %101 = arith.addf %100, %99 : vector<8x32xf32>
    %102 = arith.divf %100, %101 : vector<8x32xf32>
    %103 = arith.mulf %94, %69 : vector<8x32xf32>
    %104 = arith.mulf %88, %96 : vector<8x32xf32>
    %105 = arith.addf %103, %104 : vector<8x32xf32>
    %106 = math.tanh %105 : vector<8x32xf32>
    %107 = arith.mulf %102, %106 : vector<8x32xf32>
    %c8_i32_34 = arith.constant 8 : i32
    %108 = arith.muli %c2_i32, %c8_i32_34 : i32
    %109 = tpu.assume_multiple %108, 8 : i32
    %110 = arith.index_cast %109 : i32 to index
    %c0_35 = arith.constant 0 : index
    %111 = vector.load %arg12[%110, %c0_35] : memref<64x32xf32, #tpu.memory_space<vmem>>, vector<8x32xf32>
    tpu.vector_store %arg12[%110, %c0_35], %107 {strides = array<i32>} : memref<64x32xf32, #tpu.memory_space<vmem>>, vector<8x32xf32>,
    %c3_i32 = arith.constant 3 : i32
    %112 = arith.index_cast %c3_i32 : i32 to index
    %c0_36 = arith.constant 0 : index
    %c0_37 = arith.constant 0 : index
    %113 = vector.load %arg1[%112, %c0_36, %c0_37] : memref<8x8x128xf32, #tpu.memory_space<vmem>>, vector<1x8x128xf32>
    %114 = vector.shape_cast %113 : vector<1x8x128xf32> to vector<8x128xf32>
    %c0_38 = arith.constant 0 : index
    %c0_39 = arith.constant 0 : index
    %c0_40 = arith.constant 0 : index
    %115 = vector.load %arg3[%c0_38, %c0_39, %c0_40] : memref<2x32x128xf32, #tpu.memory_space<vmem>>, vector<1x32x128xf32>
    %116 = vector.shape_cast %115 : vector<1x32x128xf32> to vector<32x128xf32>
    %cst_41 = arith.constant dense<0.000000e+00> : vector<8x128xf32>
    %117 = tpu.matmul %107, %116, %cst_41 {dimension_numbers = #tpu.dot_dimension_numbers<[1], [0], [0], [1], [0, 0, 1, 1], [], []>} : vector<8x32xf32>, vector<32x128xf32>, vector<8x128xf32> -> vector<8x128xf32>
    %118 = arith.addf %114, %117 : vector<8x128xf32>
    %119 = vector.extract_strided_slice %118 {offsets = [0, 0], sizes = [8, 32], strides = [1, 1]} : vector<8x128xf32> to vector<8x32xf32>
    %120 = arith.negf %119 : vector<8x32xf32>
    %121 = math.exp %120 : vector<8x32xf32>
    %cst_42 = arith.constant 1.000000e+00 : f32
    %122 = vector.broadcast %cst_42 : f32 to vector<8x32xf32>
    %123 = arith.addf %122, %121 : vector<8x32xf32>
    %124 = arith.divf %122, %123 : vector<8x32xf32>
    %125 = vector.extract_strided_slice %118 {offsets = [0, 32], sizes = [8, 32], strides = [1, 1]} : vector<8x128xf32> to vector<8x32xf32>
    %126 = arith.negf %125 : vector<8x32xf32>
    %127 = math.exp %126 : vector<8x32xf32>
    %cst_43 = arith.constant 1.000000e+00 : f32
    %128 = vector.broadcast %cst_43 : f32 to vector<8x32xf32>
    %129 = arith.addf %128, %127 : vector<8x32xf32>
    %130 = arith.divf %128, %129 : vector<8x32xf32>
    %131 = vector.extract_strided_slice %118 {offsets = [0, 64], sizes = [8, 32], strides = [1, 1]} : vector<8x128xf32> to vector<8x32xf32>
    %132 = math.tanh %131 : vector<8x32xf32>
    %133 = vector.extract_strided_slice %118 {offsets = [0, 96], sizes = [8, 32], strides = [1, 1]} : vector<8x128xf32> to vector<8x32xf32>
    %134 = arith.negf %133 : vector<8x32xf32>
    %135 = math.exp %134 : vector<8x32xf32>
    %cst_44 = arith.constant 1.000000e+00 : f32
    %136 = vector.broadcast %cst_44 : f32 to vector<8x32xf32>
    %137 = arith.addf %136, %135 : vector<8x32xf32>
    %138 = arith.divf %136, %137 : vector<8x32xf32>
    %139 = arith.mulf %130, %105 : vector<8x32xf32>
    %140 = arith.mulf %124, %132 : vector<8x32xf32>
    %141 = arith.addf %139, %140 : vector<8x32xf32>
    %142 = math.tanh %141 : vector<8x32xf32>
    %143 = arith.mulf %138, %142 : vector<8x32xf32>
    %c8_i32_45 = arith.constant 8 : i32
    %144 = arith.muli %c3_i32, %c8_i32_45 : i32
    %145 = tpu.assume_multiple %144, 8 : i32
    %146 = arith.index_cast %145 : i32 to index
    %c0_46 = arith.constant 0 : index
    %147 = vector.load %arg12[%146, %c0_46] : memref<64x32xf32, #tpu.memory_space<vmem>>, vector<8x32xf32>
    tpu.vector_store %arg12[%146, %c0_46], %143 {strides = array<i32>} : memref<64x32xf32, #tpu.memory_space<vmem>>, vector<8x32xf32>,
    %c4_i32 = arith.constant 4 : i32
    %148 = arith.index_cast %c4_i32 : i32 to index
    %c0_47 = arith.constant 0 : index
    %c0_48 = arith.constant 0 : index
    %149 = vector.load %arg1[%148, %c0_47, %c0_48] : memref<8x8x128xf32, #tpu.memory_space<vmem>>, vector<1x8x128xf32>
    %150 = vector.shape_cast %149 : vector<1x8x128xf32> to vector<8x128xf32>
    %c0_49 = arith.constant 0 : index
    %c0_50 = arith.constant 0 : index
    %c0_51 = arith.constant 0 : index
    %151 = vector.load %arg3[%c0_49, %c0_50, %c0_51] : memref<2x32x128xf32, #tpu.memory_space<vmem>>, vector<1x32x128xf32>
    %152 = vector.shape_cast %151 : vector<1x32x128xf32> to vector<32x128xf32>
    %cst_52 = arith.constant dense<0.000000e+00> : vector<8x128xf32>
    %153 = tpu.matmul %143, %152, %cst_52 {dimension_numbers = #tpu.dot_dimension_numbers<[1], [0], [0], [1], [0, 0, 1, 1], [], []>} : vector<8x32xf32>, vector<32x128xf32>, vector<8x128xf32> -> vector<8x128xf32>
    %154 = arith.addf %150, %153 : vector<8x128xf32>
    %155 = vector.extract_strided_slice %154 {offsets = [0, 0], sizes = [8, 32], strides = [1, 1]} : vector<8x128xf32> to vector<8x32xf32>
    %156 = arith.negf %155 : vector<8x32xf32>
    %157 = math.exp %156 : vector<8x32xf32>
    %cst_53 = arith.constant 1.000000e+00 : f32
    %158 = vector.broadcast %cst_53 : f32 to vector<8x32xf32>
    %159 = arith.addf %158, %157 : vector<8x32xf32>
    %160 = arith.divf %158, %159 : vector<8x32xf32>
    %161 = vector.extract_strided_slice %154 {offsets = [0, 32], sizes = [8, 32], strides = [1, 1]} : vector<8x128xf32> to vector<8x32xf32>
    %162 = arith.negf %161 : vector<8x32xf32>
    %163 = math.exp %162 : vector<8x32xf32>
    %cst_54 = arith.constant 1.000000e+00 : f32
    %164 = vector.broadcast %cst_54 : f32 to vector<8x32xf32>
    %165 = arith.addf %164, %163 : vector<8x32xf32>
    %166 = arith.divf %164, %165 : vector<8x32xf32>
    %167 = vector.extract_strided_slice %154 {offsets = [0, 64], sizes = [8, 32], strides = [1, 1]} : vector<8x128xf32> to vector<8x32xf32>
    %168 = math.tanh %167 : vector<8x32xf32>
    %169 = vector.extract_strided_slice %154 {offsets = [0, 96], sizes = [8, 32], strides = [1, 1]} : vector<8x128xf32> to vector<8x32xf32>
    %170 = arith.negf %169 : vector<8x32xf32>
    %171 = math.exp %170 : vector<8x32xf32>
    %cst_55 = arith.constant 1.000000e+00 : f32
    %172 = vector.broadcast %cst_55 : f32 to vector<8x32xf32>
    %173 = arith.addf %172, %171 : vector<8x32xf32>
    %174 = arith.divf %172, %173 : vector<8x32xf32>
    %175 = arith.mulf %166, %141 : vector<8x32xf32>
    %176 = arith.mulf %160, %168 : vector<8x32xf32>
    %177 = arith.addf %175, %176 : vector<8x32xf32>
    %178 = math.tanh %177 : vector<8x32xf32>
    %179 = arith.mulf %174, %178 : vector<8x32xf32>
    %c8_i32_56 = arith.constant 8 : i32
    %180 = arith.muli %c4_i32, %c8_i32_56 : i32
    %181 = tpu.assume_multiple %180, 8 : i32
    %182 = arith.index_cast %181 : i32 to index
    %c0_57 = arith.constant 0 : index
    %183 = vector.load %arg12[%182, %c0_57] : memref<64x32xf32, #tpu.memory_space<vmem>>, vector<8x32xf32>
    tpu.vector_store %arg12[%182, %c0_57], %179 {strides = array<i32>} : memref<64x32xf32, #tpu.memory_space<vmem>>, vector<8x32xf32>,
    %c5_i32 = arith.constant 5 : i32
    %184 = arith.index_cast %c5_i32 : i32 to index
    %c0_58 = arith.constant 0 : index
    %c0_59 = arith.constant 0 : index
    %185 = vector.load %arg1[%184, %c0_58, %c0_59] : memref<8x8x128xf32, #tpu.memory_space<vmem>>, vector<1x8x128xf32>
    %186 = vector.shape_cast %185 : vector<1x8x128xf32> to vector<8x128xf32>
    %c0_60 = arith.constant 0 : index
    %c0_61 = arith.constant 0 : index
    %c0_62 = arith.constant 0 : index
    %187 = vector.load %arg3[%c0_60, %c0_61, %c0_62] : memref<2x32x128xf32, #tpu.memory_space<vmem>>, vector<1x32x128xf32>
    %188 = vector.shape_cast %187 : vector<1x32x128xf32> to vector<32x128xf32>
    %cst_63 = arith.constant dense<0.000000e+00> : vector<8x128xf32>
    %189 = tpu.matmul %179, %188, %cst_63 {dimension_numbers = #tpu.dot_dimension_numbers<[1], [0], [0], [1], [0, 0, 1, 1], [], []>} : vector<8x32xf32>, vector<32x128xf32>, vector<8x128xf32> -> vector<8x128xf32>
    %190 = arith.addf %186, %189 : vector<8x128xf32>
    %191 = vector.extract_strided_slice %190 {offsets = [0, 0], sizes = [8, 32], strides = [1, 1]} : vector<8x128xf32> to vector<8x32xf32>
    %192 = arith.negf %191 : vector<8x32xf32>
    %193 = math.exp %192 : vector<8x32xf32>
    %cst_64 = arith.constant 1.000000e+00 : f32
    %194 = vector.broadcast %cst_64 : f32 to vector<8x32xf32>
    %195 = arith.addf %194, %193 : vector<8x32xf32>
    %196 = arith.divf %194, %195 : vector<8x32xf32>
    %197 = vector.extract_strided_slice %190 {offsets = [0, 32], sizes = [8, 32], strides = [1, 1]} : vector<8x128xf32> to vector<8x32xf32>
    %198 = arith.negf %197 : vector<8x32xf32>
    %199 = math.exp %198 : vector<8x32xf32>
    %cst_65 = arith.constant 1.000000e+00 : f32
    %200 = vector.broadcast %cst_65 : f32 to vector<8x32xf32>
    %201 = arith.addf %200, %199 : vector<8x32xf32>
    %202 = arith.divf %200, %201 : vector<8x32xf32>
    %203 = vector.extract_strided_slice %190 {offsets = [0, 64], sizes = [8, 32], strides = [1, 1]} : vector<8x128xf32> to vector<8x32xf32>
    %204 = math.tanh %203 : vector<8x32xf32>
    %205 = vector.extract_strided_slice %190 {offsets = [0, 96], sizes = [8, 32], strides = [1, 1]} : vector<8x128xf32> to vector<8x32xf32>
    %206 = arith.negf %205 : vector<8x32xf32>
    %207 = math.exp %206 : vector<8x32xf32>
    %cst_66 = arith.constant 1.000000e+00 : f32
    %208 = vector.broadcast %cst_66 : f32 to vector<8x32xf32>
    %209 = arith.addf %208, %207 : vector<8x32xf32>
    %210 = arith.divf %208, %209 : vector<8x32xf32>
    %211 = arith.mulf %202, %177 : vector<8x32xf32>
    %212 = arith.mulf %196, %204 : vector<8x32xf32>
    %213 = arith.addf %211, %212 : vector<8x32xf32>
    %214 = math.tanh %213 : vector<8x32xf32>
    %215 = arith.mulf %210, %214 : vector<8x32xf32>
    %c8_i32_67 = arith.constant 8 : i32
    %216 = arith.muli %c5_i32, %c8_i32_67 : i32
    %217 = tpu.assume_multiple %216, 8 : i32
    %218 = arith.index_cast %217 : i32 to index
    %c0_68 = arith.constant 0 : index
    %219 = vector.load %arg12[%218, %c0_68] : memref<64x32xf32, #tpu.memory_space<vmem>>, vector<8x32xf32>
    tpu.vector_store %arg12[%218, %c0_68], %215 {strides = array<i32>} : memref<64x32xf32, #tpu.memory_space<vmem>>, vector<8x32xf32>,
    %c6_i32 = arith.constant 6 : i32
    %220 = arith.index_cast %c6_i32 : i32 to index
    %c0_69 = arith.constant 0 : index
    %c0_70 = arith.constant 0 : index
    %221 = vector.load %arg1[%220, %c0_69, %c0_70] : memref<8x8x128xf32, #tpu.memory_space<vmem>>, vector<1x8x128xf32>
    %222 = vector.shape_cast %221 : vector<1x8x128xf32> to vector<8x128xf32>
    %c0_71 = arith.constant 0 : index
    %c0_72 = arith.constant 0 : index
    %c0_73 = arith.constant 0 : index
    %223 = vector.load %arg3[%c0_71, %c0_72, %c0_73] : memref<2x32x128xf32, #tpu.memory_space<vmem>>, vector<1x32x128xf32>
    %224 = vector.shape_cast %223 : vector<1x32x128xf32> to vector<32x128xf32>
    %cst_74 = arith.constant dense<0.000000e+00> : vector<8x128xf32>
    %225 = tpu.matmul %215, %224, %cst_74 {dimension_numbers = #tpu.dot_dimension_numbers<[1], [0], [0], [1], [0, 0, 1, 1], [], []>} : vector<8x32xf32>, vector<32x128xf32>, vector<8x128xf32> -> vector<8x128xf32>
    %226 = arith.addf %222, %225 : vector<8x128xf32>
    %227 = vector.extract_strided_slice %226 {offsets = [0, 0], sizes = [8, 32], strides = [1, 1]} : vector<8x128xf32> to vector<8x32xf32>
    %228 = arith.negf %227 : vector<8x32xf32>
    %229 = math.exp %228 : vector<8x32xf32>
    %cst_75 = arith.constant 1.000000e+00 : f32
    %230 = vector.broadcast %cst_75 : f32 to vector<8x32xf32>
    %231 = arith.addf %230, %229 : vector<8x32xf32>
    %232 = arith.divf %230, %231 : vector<8x32xf32>
    %233 = vector.extract_strided_slice %226 {offsets = [0, 32], sizes = [8, 32], strides = [1, 1]} : vector<8x128xf32> to vector<8x32xf32>
    %234 = arith.negf %233 : vector<8x32xf32>
    %235 = math.exp %234 : vector<8x32xf32>
    %cst_76 = arith.constant 1.000000e+00 : f32
    %236 = vector.broadcast %cst_76 : f32 to vector<8x32xf32>
    %237 = arith.addf %236, %235 : vector<8x32xf32>
    %238 = arith.divf %236, %237 : vector<8x32xf32>
    %239 = vector.extract_strided_slice %226 {offsets = [0, 64], sizes = [8, 32], strides = [1, 1]} : vector<8x128xf32> to vector<8x32xf32>
    %240 = math.tanh %239 : vector<8x32xf32>
    %241 = vector.extract_strided_slice %226 {offsets = [0, 96], sizes = [8, 32], strides = [1, 1]} : vector<8x128xf32> to vector<8x32xf32>
    %242 = arith.negf %241 : vector<8x32xf32>
    %243 = math.exp %242 : vector<8x32xf32>
    %cst_77 = arith.constant 1.000000e+00 : f32
    %244 = vector.broadcast %cst_77 : f32 to vector<8x32xf32>
    %245 = arith.addf %244, %243 : vector<8x32xf32>
    %246 = arith.divf %244, %245 : vector<8x32xf32>
    %247 = arith.mulf %238, %213 : vector<8x32xf32>
    %248 = arith.mulf %232, %240 : vector<8x32xf32>
    %249 = arith.addf %247, %248 : vector<8x32xf32>
    %250 = math.tanh %249 : vector<8x32xf32>
    %251 = arith.mulf %246, %250 : vector<8x32xf32>
    %c8_i32_78 = arith.constant 8 : i32
    %252 = arith.muli %c6_i32, %c8_i32_78 : i32
    %253 = tpu.assume_multiple %252, 8 : i32
    %254 = arith.index_cast %253 : i32 to index
    %c0_79 = arith.constant 0 : index
    %255 = vector.load %arg12[%254, %c0_79] : memref<64x32xf32, #tpu.memory_space<vmem>>, vector<8x32xf32>
    tpu.vector_store %arg12[%254, %c0_79], %251 {strides = array<i32>} : memref<64x32xf32, #tpu.memory_space<vmem>>, vector<8x32xf32>,
    %c7_i32 = arith.constant 7 : i32
    %256 = arith.index_cast %c7_i32 : i32 to index
    %c0_80 = arith.constant 0 : index
    %c0_81 = arith.constant 0 : index
    %257 = vector.load %arg1[%256, %c0_80, %c0_81] : memref<8x8x128xf32, #tpu.memory_space<vmem>>, vector<1x8x128xf32>
    %258 = vector.shape_cast %257 : vector<1x8x128xf32> to vector<8x128xf32>
    %c0_82 = arith.constant 0 : index
    %c0_83 = arith.constant 0 : index
    %c0_84 = arith.constant 0 : index
    %259 = vector.load %arg3[%c0_82, %c0_83, %c0_84] : memref<2x32x128xf32, #tpu.memory_space<vmem>>, vector<1x32x128xf32>
    %260 = vector.shape_cast %259 : vector<1x32x128xf32> to vector<32x128xf32>
    %cst_85 = arith.constant dense<0.000000e+00> : vector<8x128xf32>
    %261 = tpu.matmul %251, %260, %cst_85 {dimension_numbers = #tpu.dot_dimension_numbers<[1], [0], [0], [1], [0, 0, 1, 1], [], []>} : vector<8x32xf32>, vector<32x128xf32>, vector<8x128xf32> -> vector<8x128xf32>
    %262 = arith.addf %258, %261 : vector<8x128xf32>
    %263 = vector.extract_strided_slice %262 {offsets = [0, 0], sizes = [8, 32], strides = [1, 1]} : vector<8x128xf32> to vector<8x32xf32>
    %264 = arith.negf %263 : vector<8x32xf32>
    %265 = math.exp %264 : vector<8x32xf32>
    %cst_86 = arith.constant 1.000000e+00 : f32
    %266 = vector.broadcast %cst_86 : f32 to vector<8x32xf32>
    %267 = arith.addf %266, %265 : vector<8x32xf32>
    %268 = arith.divf %266, %267 : vector<8x32xf32>
    %269 = vector.extract_strided_slice %262 {offsets = [0, 32], sizes = [8, 32], strides = [1, 1]} : vector<8x128xf32> to vector<8x32xf32>
    %270 = arith.negf %269 : vector<8x32xf32>
    %271 = math.exp %270 : vector<8x32xf32>
    %cst_87 = arith.constant 1.000000e+00 : f32
    %272 = vector.broadcast %cst_87 : f32 to vector<8x32xf32>
    %273 = arith.addf %272, %271 : vector<8x32xf32>
    %274 = arith.divf %272, %273 : vector<8x32xf32>
    %275 = vector.extract_strided_slice %262 {offsets = [0, 64], sizes = [8, 32], strides = [1, 1]} : vector<8x128xf32> to vector<8x32xf32>
    %276 = math.tanh %275 : vector<8x32xf32>
    %277 = vector.extract_strided_slice %262 {offsets = [0, 96], sizes = [8, 32], strides = [1, 1]} : vector<8x128xf32> to vector<8x32xf32>
    %278 = arith.negf %277 : vector<8x32xf32>
    %279 = math.exp %278 : vector<8x32xf32>
    %cst_88 = arith.constant 1.000000e+00 : f32
    %280 = vector.broadcast %cst_88 : f32 to vector<8x32xf32>
    %281 = arith.addf %280, %279 : vector<8x32xf32>
    %282 = arith.divf %280, %281 : vector<8x32xf32>
    %283 = arith.mulf %274, %249 : vector<8x32xf32>
    %284 = arith.mulf %268, %276 : vector<8x32xf32>
    %285 = arith.addf %283, %284 : vector<8x32xf32>
    %286 = math.tanh %285 : vector<8x32xf32>
    %287 = arith.mulf %282, %286 : vector<8x32xf32>
    %c8_i32_89 = arith.constant 8 : i32
    %288 = arith.muli %c7_i32, %c8_i32_89 : i32
    %289 = tpu.assume_multiple %288, 8 : i32
    %290 = arith.index_cast %289 : i32 to index
    %c0_90 = arith.constant 0 : index
    %291 = vector.load %arg12[%290, %c0_90] : memref<64x32xf32, #tpu.memory_space<vmem>>, vector<8x32xf32>
    tpu.vector_store %arg12[%290, %c0_90], %287 {strides = array<i32>} : memref<64x32xf32, #tpu.memory_space<vmem>>, vector<8x32xf32>,
    %c8_i32_91 = arith.constant 8 : i32
    %c0_92 = arith.constant 0 : index
    %c0_93 = arith.constant 0 : index
    %c0_94 = arith.constant 0 : index
    %292 = vector.load %arg10[%c0_92, %c0_93, %c0_94] : memref<2x8x32xf32, #tpu.memory_space<vmem>>, vector<1x8x32xf32>
    %293 = vector.shape_cast %292 : vector<1x8x32xf32> to vector<8x32xf32>
    %294 = vector.shape_cast %287 : vector<8x32xf32> to vector<1x8x32xf32>
    tpu.vector_store %arg10[%c0_92, %c0_93, %c0_94], %294 {strides = array<i32>} : memref<2x8x32xf32, #tpu.memory_space<vmem>>, vector<1x8x32xf32>,
    %c0_95 = arith.constant 0 : index
    %c0_96 = arith.constant 0 : index
    %c0_97 = arith.constant 0 : index
    %295 = vector.load %arg11[%c0_95, %c0_96, %c0_97] : memref<2x8x32xf32, #tpu.memory_space<vmem>>, vector<1x8x32xf32>
    %296 = vector.shape_cast %295 : vector<1x8x32xf32> to vector<8x32xf32>
    %297 = vector.shape_cast %285 : vector<8x32xf32> to vector<1x8x32xf32>
    tpu.vector_store %arg11[%c0_95, %c0_96, %c0_97], %297 {strides = array<i32>} : memref<2x8x32xf32, #tpu.memory_space<vmem>>, vector<1x8x32xf32>,
    %c0_98 = arith.constant 0 : index
    %c0_99 = arith.constant 0 : index
    %298 = vector.load %arg12[%c0_98, %c0_99] : memref<64x32xf32, #tpu.memory_space<vmem>>, vector<64x32xf32>
    %c0_100 = arith.constant 0 : index
    %c0_101 = arith.constant 0 : index
    %c0_102 = arith.constant 0 : index
    %299 = vector.load %arg2[%c0_100, %c0_101, %c0_102] : memref<1x32x128xf32, #tpu.memory_space<vmem>>, vector<1x32x128xf32>
    %300 = vector.shape_cast %299 : vector<1x32x128xf32> to vector<32x128xf32>
    %cst_103 = arith.constant dense<0.000000e+00> : vector<64x128xf32>
    %301 = tpu.matmul %298, %300, %cst_103 {dimension_numbers = #tpu.dot_dimension_numbers<[1], [0], [0], [1], [0, 0, 1, 1], [], []>} : vector<64x32xf32>, vector<32x128xf32>, vector<64x128xf32> -> vector<64x128xf32>
    %c0_104 = arith.constant 0 : index
    %c0_105 = arith.constant 0 : index
    %c0_106 = arith.constant 0 : index
    %302 = vector.load %arg4[%c0_104, %c0_105, %c0_106] : memref<1x1x128xf32, #tpu.memory_space<vmem>>, vector<1x1x128xf32>
    %303 = vector.shape_cast %302 : vector<1x1x128xf32> to vector<1x128xf32>
    %304 = vector.broadcast %303 : vector<1x128xf32> to vector<64x128xf32>
    %305 = arith.addf %301, %304 : vector<64x128xf32>
    %c0_107 = arith.constant 0 : index
    %c0_108 = arith.constant 0 : index
    %306 = vector.load %arg13[%c0_107, %c0_108] : memref<64x128xf32, #tpu.memory_space<vmem>>, vector<64x128xf32>
    tpu.vector_store %arg13[%c0_107, %c0_108], %305 {strides = array<i32>} : memref<64x128xf32, #tpu.memory_space<vmem>>, vector<64x128xf32>,
    %c1 = arith.constant 1 : index
    %c0_109 = arith.constant 0 : index
    %c0_110 = arith.constant 0 : index
    %307 = vector.load %arg5[%c1, %c0_109, %c0_110] : memref<2x8x32xf32, #tpu.memory_space<vmem>>, vector<1x8x32xf32>
    %308 = vector.shape_cast %307 : vector<1x8x32xf32> to vector<8x32xf32>
    %c1_111 = arith.constant 1 : index
    %c0_112 = arith.constant 0 : index
    %c0_113 = arith.constant 0 : index
    %309 = vector.load %arg6[%c1_111, %c0_112, %c0_113] : memref<2x8x32xf32, #tpu.memory_space<vmem>>, vector<1x8x32xf32>
    %310 = vector.shape_cast %309 : vector<1x8x32xf32> to vector<8x32xf32>
    %c0_i32_114 = arith.constant 0 : i32
    %c8_i32_115 = arith.constant 8 : i32
    %311 = arith.muli %c0_i32_114, %c8_i32_115 : i32
    %312 = tpu.assume_multiple %311, 8 : i32
    %313 = arith.index_cast %312 : i32 to index
    %c0_116 = arith.constant 0 : index
    %314 = vector.load %arg13[%313, %c0_116] : memref<64x128xf32, #tpu.memory_space<vmem>>, vector<8x128xf32>
    %c1_117 = arith.constant 1 : index
    %c0_118 = arith.constant 0 : index
    %c0_119 = arith.constant 0 : index
    %315 = vector.load %arg3[%c1_117, %c0_118, %c0_119] : memref<2x32x128xf32, #tpu.memory_space<vmem>>, vector<1x32x128xf32>
    %316 = vector.shape_cast %315 : vector<1x32x128xf32> to vector<32x128xf32>
    %cst_120 = arith.constant dense<0.000000e+00> : vector<8x128xf32>
    %317 = tpu.matmul %308, %316, %cst_120 {dimension_numbers = #tpu.dot_dimension_numbers<[1], [0], [0], [1], [0, 0, 1, 1], [], []>} : vector<8x32xf32>, vector<32x128xf32>, vector<8x128xf32> -> vector<8x128xf32>
    %318 = arith.addf %314, %317 : vector<8x128xf32>
    %319 = vector.extract_strided_slice %318 {offsets = [0, 0], sizes = [8, 32], strides = [1, 1]} : vector<8x128xf32> to vector<8x32xf32>
    %320 = arith.negf %319 : vector<8x32xf32>
    %321 = math.exp %320 : vector<8x32xf32>
    %cst_121 = arith.constant 1.000000e+00 : f32
    %322 = vector.broadcast %cst_121 : f32 to vector<8x32xf32>
    %323 = arith.addf %322, %321 : vector<8x32xf32>
    %324 = arith.divf %322, %323 : vector<8x32xf32>
    %325 = vector.extract_strided_slice %318 {offsets = [0, 32], sizes = [8, 32], strides = [1, 1]} : vector<8x128xf32> to vector<8x32xf32>
    %326 = arith.negf %325 : vector<8x32xf32>
    %327 = math.exp %326 : vector<8x32xf32>
    %cst_122 = arith.constant 1.000000e+00 : f32
    %328 = vector.broadcast %cst_122 : f32 to vector<8x32xf32>
    %329 = arith.addf %328, %327 : vector<8x32xf32>
    %330 = arith.divf %328, %329 : vector<8x32xf32>
    %331 = vector.extract_strided_slice %318 {offsets = [0, 64], sizes = [8, 32], strides = [1, 1]} : vector<8x128xf32> to vector<8x32xf32>
    %332 = math.tanh %331 : vector<8x32xf32>
    %333 = vector.extract_strided_slice %318 {offsets = [0, 96], sizes = [8, 32], strides = [1, 1]} : vector<8x128xf32> to vector<8x32xf32>
    %334 = arith.negf %333 : vector<8x32xf32>
    %335 = math.exp %334 : vector<8x32xf32>
    %cst_123 = arith.constant 1.000000e+00 : f32
    %336 = vector.broadcast %cst_123 : f32 to vector<8x32xf32>
    %337 = arith.addf %336, %335 : vector<8x32xf32>
    %338 = arith.divf %336, %337 : vector<8x32xf32>
    %339 = arith.mulf %330, %310 : vector<8x32xf32>
    %340 = arith.mulf %324, %332 : vector<8x32xf32>
    %341 = arith.addf %339, %340 : vector<8x32xf32>
    %342 = math.tanh %341 : vector<8x32xf32>
    %343 = arith.mulf %338, %342 : vector<8x32xf32>
    %344 = arith.index_cast %312 : i32 to index
    %c0_124 = arith.constant 0 : index
    %345 = vector.load %arg12[%344, %c0_124] : memref<64x32xf32, #tpu.memory_space<vmem>>, vector<8x32xf32>
    tpu.vector_store %arg12[%344, %c0_124], %343 {strides = array<i32>} : memref<64x32xf32, #tpu.memory_space<vmem>>, vector<8x32xf32>,
    %c1_i32_125 = arith.constant 1 : i32
    %c8_i32_126 = arith.constant 8 : i32
    %346 = arith.muli %c1_i32_125, %c8_i32_126 : i32
    %347 = tpu.assume_multiple %346, 8 : i32
    %348 = arith.index_cast %347 : i32 to index
    %c0_127 = arith.constant 0 : index
    %349 = vector.load %arg13[%348, %c0_127] : memref<64x128xf32, #tpu.memory_space<vmem>>, vector<8x128xf32>
    %c1_128 = arith.constant 1 : index
    %c0_129 = arith.constant 0 : index
    %c0_130 = arith.constant 0 : index
    %350 = vector.load %arg3[%c1_128, %c0_129, %c0_130] : memref<2x32x128xf32, #tpu.memory_space<vmem>>, vector<1x32x128xf32>
    %351 = vector.shape_cast %350 : vector<1x32x128xf32> to vector<32x128xf32>
    %cst_131 = arith.constant dense<0.000000e+00> : vector<8x128xf32>
    %352 = tpu.matmul %343, %351, %cst_131 {dimension_numbers = #tpu.dot_dimension_numbers<[1], [0], [0], [1], [0, 0, 1, 1], [], []>} : vector<8x32xf32>, vector<32x128xf32>, vector<8x128xf32> -> vector<8x128xf32>
    %353 = arith.addf %349, %352 : vector<8x128xf32>
    %354 = vector.extract_strided_slice %353 {offsets = [0, 0], sizes = [8, 32], strides = [1, 1]} : vector<8x128xf32> to vector<8x32xf32>
    %355 = arith.negf %354 : vector<8x32xf32>
    %356 = math.exp %355 : vector<8x32xf32>
    %cst_132 = arith.constant 1.000000e+00 : f32
    %357 = vector.broadcast %cst_132 : f32 to vector<8x32xf32>
    %358 = arith.addf %357, %356 : vector<8x32xf32>
    %359 = arith.divf %357, %358 : vector<8x32xf32>
    %360 = vector.extract_strided_slice %353 {offsets = [0, 32], sizes = [8, 32], strides = [1, 1]} : vector<8x128xf32> to vector<8x32xf32>
    %361 = arith.negf %360 : vector<8x32xf32>
    %362 = math.exp %361 : vector<8x32xf32>
    %cst_133 = arith.constant 1.000000e+00 : f32
    %363 = vector.broadcast %cst_133 : f32 to vector<8x32xf32>
    %364 = arith.addf %363, %362 : vector<8x32xf32>
    %365 = arith.divf %363, %364 : vector<8x32xf32>
    %366 = vector.extract_strided_slice %353 {offsets = [0, 64], sizes = [8, 32], strides = [1, 1]} : vector<8x128xf32> to vector<8x32xf32>
    %367 = math.tanh %366 : vector<8x32xf32>
    %368 = vector.extract_strided_slice %353 {offsets = [0, 96], sizes = [8, 32], strides = [1, 1]} : vector<8x128xf32> to vector<8x32xf32>
    %369 = arith.negf %368 : vector<8x32xf32>
    %370 = math.exp %369 : vector<8x32xf32>
    %cst_134 = arith.constant 1.000000e+00 : f32
    %371 = vector.broadcast %cst_134 : f32 to vector<8x32xf32>
    %372 = arith.addf %371, %370 : vector<8x32xf32>
    %373 = arith.divf %371, %372 : vector<8x32xf32>
    %374 = arith.mulf %365, %341 : vector<8x32xf32>
    %375 = arith.mulf %359, %367 : vector<8x32xf32>
    %376 = arith.addf %374, %375 : vector<8x32xf32>
    %377 = math.tanh %376 : vector<8x32xf32>
    %378 = arith.mulf %373, %377 : vector<8x32xf32>
    %379 = arith.index_cast %347 : i32 to index
    %c0_135 = arith.constant 0 : index
    %380 = vector.load %arg12[%379, %c0_135] : memref<64x32xf32, #tpu.memory_space<vmem>>, vector<8x32xf32>
    tpu.vector_store %arg12[%379, %c0_135], %378 {strides = array<i32>} : memref<64x32xf32, #tpu.memory_space<vmem>>, vector<8x32xf32>,
    %c2_i32_136 = arith.constant 2 : i32
    %c8_i32_137 = arith.constant 8 : i32
    %381 = arith.muli %c2_i32_136, %c8_i32_137 : i32
    %382 = tpu.assume_multiple %381, 8 : i32
    %383 = arith.index_cast %382 : i32 to index
    %c0_138 = arith.constant 0 : index
    %384 = vector.load %arg13[%383, %c0_138] : memref<64x128xf32, #tpu.memory_space<vmem>>, vector<8x128xf32>
    %c1_139 = arith.constant 1 : index
    %c0_140 = arith.constant 0 : index
    %c0_141 = arith.constant 0 : index
    %385 = vector.load %arg3[%c1_139, %c0_140, %c0_141] : memref<2x32x128xf32, #tpu.memory_space<vmem>>, vector<1x32x128xf32>
    %386 = vector.shape_cast %385 : vector<1x32x128xf32> to vector<32x128xf32>
    %cst_142 = arith.constant dense<0.000000e+00> : vector<8x128xf32>
    %387 = tpu.matmul %378, %386, %cst_142 {dimension_numbers = #tpu.dot_dimension_numbers<[1], [0], [0], [1], [0, 0, 1, 1], [], []>} : vector<8x32xf32>, vector<32x128xf32>, vector<8x128xf32> -> vector<8x128xf32>
    %388 = arith.addf %384, %387 : vector<8x128xf32>
    %389 = vector.extract_strided_slice %388 {offsets = [0, 0], sizes = [8, 32], strides = [1, 1]} : vector<8x128xf32> to vector<8x32xf32>
    %390 = arith.negf %389 : vector<8x32xf32>
    %391 = math.exp %390 : vector<8x32xf32>
    %cst_143 = arith.constant 1.000000e+00 : f32
    %392 = vector.broadcast %cst_143 : f32 to vector<8x32xf32>
    %393 = arith.addf %392, %391 : vector<8x32xf32>
    %394 = arith.divf %392, %393 : vector<8x32xf32>
    %395 = vector.extract_strided_slice %388 {offsets = [0, 32], sizes = [8, 32], strides = [1, 1]} : vector<8x128xf32> to vector<8x32xf32>
    %396 = arith.negf %395 : vector<8x32xf32>
    %397 = math.exp %396 : vector<8x32xf32>
    %cst_144 = arith.constant 1.000000e+00 : f32
    %398 = vector.broadcast %cst_144 : f32 to vector<8x32xf32>
    %399 = arith.addf %398, %397 : vector<8x32xf32>
    %400 = arith.divf %398, %399 : vector<8x32xf32>
    %401 = vector.extract_strided_slice %388 {offsets = [0, 64], sizes = [8, 32], strides = [1, 1]} : vector<8x128xf32> to vector<8x32xf32>
    %402 = math.tanh %401 : vector<8x32xf32>
    %403 = vector.extract_strided_slice %388 {offsets = [0, 96], sizes = [8, 32], strides = [1, 1]} : vector<8x128xf32> to vector<8x32xf32>
    %404 = arith.negf %403 : vector<8x32xf32>
    %405 = math.exp %404 : vector<8x32xf32>
    %cst_145 = arith.constant 1.000000e+00 : f32
    %406 = vector.broadcast %cst_145 : f32 to vector<8x32xf32>
    %407 = arith.addf %406, %405 : vector<8x32xf32>
    %408 = arith.divf %406, %407 : vector<8x32xf32>
    %409 = arith.mulf %400, %376 : vector<8x32xf32>
    %410 = arith.mulf %394, %402 : vector<8x32xf32>
    %411 = arith.addf %409, %410 : vector<8x32xf32>
    %412 = math.tanh %411 : vector<8x32xf32>
    %413 = arith.mulf %408, %412 : vector<8x32xf32>
    %414 = arith.index_cast %382 : i32 to index
    %c0_146 = arith.constant 0 : index
    %415 = vector.load %arg12[%414, %c0_146] : memref<64x32xf32, #tpu.memory_space<vmem>>, vector<8x32xf32>
    tpu.vector_store %arg12[%414, %c0_146], %413 {strides = array<i32>} : memref<64x32xf32, #tpu.memory_space<vmem>>, vector<8x32xf32>,
    %c3_i32_147 = arith.constant 3 : i32
    %c8_i32_148 = arith.constant 8 : i32
    %416 = arith.muli %c3_i32_147, %c8_i32_148 : i32
    %417 = tpu.assume_multiple %416, 8 : i32
    %418 = arith.index_cast %417 : i32 to index
    %c0_149 = arith.constant 0 : index
    %419 = vector.load %arg13[%418, %c0_149] : memref<64x128xf32, #tpu.memory_space<vmem>>, vector<8x128xf32>
    %c1_150 = arith.constant 1 : index
    %c0_151 = arith.constant 0 : index
    %c0_152 = arith.constant 0 : index
    %420 = vector.load %arg3[%c1_150, %c0_151, %c0_152] : memref<2x32x128xf32, #tpu.memory_space<vmem>>, vector<1x32x128xf32>
    %421 = vector.shape_cast %420 : vector<1x32x128xf32> to vector<32x128xf32>
    %cst_153 = arith.constant dense<0.000000e+00> : vector<8x128xf32>
    %422 = tpu.matmul %413, %421, %cst_153 {dimension_numbers = #tpu.dot_dimension_numbers<[1], [0], [0], [1], [0, 0, 1, 1], [], []>} : vector<8x32xf32>, vector<32x128xf32>, vector<8x128xf32> -> vector<8x128xf32>
    %423 = arith.addf %419, %422 : vector<8x128xf32>
    %424 = vector.extract_strided_slice %423 {offsets = [0, 0], sizes = [8, 32], strides = [1, 1]} : vector<8x128xf32> to vector<8x32xf32>
    %425 = arith.negf %424 : vector<8x32xf32>
    %426 = math.exp %425 : vector<8x32xf32>
    %cst_154 = arith.constant 1.000000e+00 : f32
    %427 = vector.broadcast %cst_154 : f32 to vector<8x32xf32>
    %428 = arith.addf %427, %426 : vector<8x32xf32>
    %429 = arith.divf %427, %428 : vector<8x32xf32>
    %430 = vector.extract_strided_slice %423 {offsets = [0, 32], sizes = [8, 32], strides = [1, 1]} : vector<8x128xf32> to vector<8x32xf32>
    %431 = arith.negf %430 : vector<8x32xf32>
    %432 = math.exp %431 : vector<8x32xf32>
    %cst_155 = arith.constant 1.000000e+00 : f32
    %433 = vector.broadcast %cst_155 : f32 to vector<8x32xf32>
    %434 = arith.addf %433, %432 : vector<8x32xf32>
    %435 = arith.divf %433, %434 : vector<8x32xf32>
    %436 = vector.extract_strided_slice %423 {offsets = [0, 64], sizes = [8, 32], strides = [1, 1]} : vector<8x128xf32> to vector<8x32xf32>
    %437 = math.tanh %436 : vector<8x32xf32>
    %438 = vector.extract_strided_slice %423 {offsets = [0, 96], sizes = [8, 32], strides = [1, 1]} : vector<8x128xf32> to vector<8x32xf32>
    %439 = arith.negf %438 : vector<8x32xf32>
    %440 = math.exp %439 : vector<8x32xf32>
    %cst_156 = arith.constant 1.000000e+00 : f32
    %441 = vector.broadcast %cst_156 : f32 to vector<8x32xf32>
    %442 = arith.addf %441, %440 : vector<8x32xf32>
    %443 = arith.divf %441, %442 : vector<8x32xf32>
    %444 = arith.mulf %435, %411 : vector<8x32xf32>
    %445 = arith.mulf %429, %437 : vector<8x32xf32>
    %446 = arith.addf %444, %445 : vector<8x32xf32>
    %447 = math.tanh %446 : vector<8x32xf32>
    %448 = arith.mulf %443, %447 : vector<8x32xf32>
    %449 = arith.index_cast %417 : i32 to index
    %c0_157 = arith.constant 0 : index
    %450 = vector.load %arg12[%449, %c0_157] : memref<64x32xf32, #tpu.memory_space<vmem>>, vector<8x32xf32>
    tpu.vector_store %arg12[%449, %c0_157], %448 {strides = array<i32>} : memref<64x32xf32, #tpu.memory_space<vmem>>, vector<8x32xf32>,
    %c4_i32_158 = arith.constant 4 : i32
    %c8_i32_159 = arith.constant 8 : i32
    %451 = arith.muli %c4_i32_158, %c8_i32_159 : i32
    %452 = tpu.assume_multiple %451, 8 : i32
    %453 = arith.index_cast %452 : i32 to index
    %c0_160 = arith.constant 0 : index
    %454 = vector.load %arg13[%453, %c0_160] : memref<64x128xf32, #tpu.memory_space<vmem>>, vector<8x128xf32>
    %c1_161 = arith.constant 1 : index
    %c0_162 = arith.constant 0 : index
    %c0_163 = arith.constant 0 : index
    %455 = vector.load %arg3[%c1_161, %c0_162, %c0_163] : memref<2x32x128xf32, #tpu.memory_space<vmem>>, vector<1x32x128xf32>
    %456 = vector.shape_cast %455 : vector<1x32x128xf32> to vector<32x128xf32>
    %cst_164 = arith.constant dense<0.000000e+00> : vector<8x128xf32>
    %457 = tpu.matmul %448, %456, %cst_164 {dimension_numbers = #tpu.dot_dimension_numbers<[1], [0], [0], [1], [0, 0, 1, 1], [], []>} : vector<8x32xf32>, vector<32x128xf32>, vector<8x128xf32> -> vector<8x128xf32>
    %458 = arith.addf %454, %457 : vector<8x128xf32>
    %459 = vector.extract_strided_slice %458 {offsets = [0, 0], sizes = [8, 32], strides = [1, 1]} : vector<8x128xf32> to vector<8x32xf32>
    %460 = arith.negf %459 : vector<8x32xf32>
    %461 = math.exp %460 : vector<8x32xf32>
    %cst_165 = arith.constant 1.000000e+00 : f32
    %462 = vector.broadcast %cst_165 : f32 to vector<8x32xf32>
    %463 = arith.addf %462, %461 : vector<8x32xf32>
    %464 = arith.divf %462, %463 : vector<8x32xf32>
    %465 = vector.extract_strided_slice %458 {offsets = [0, 32], sizes = [8, 32], strides = [1, 1]} : vector<8x128xf32> to vector<8x32xf32>
    %466 = arith.negf %465 : vector<8x32xf32>
    %467 = math.exp %466 : vector<8x32xf32>
    %cst_166 = arith.constant 1.000000e+00 : f32
    %468 = vector.broadcast %cst_166 : f32 to vector<8x32xf32>
    %469 = arith.addf %468, %467 : vector<8x32xf32>
    %470 = arith.divf %468, %469 : vector<8x32xf32>
    %471 = vector.extract_strided_slice %458 {offsets = [0, 64], sizes = [8, 32], strides = [1, 1]} : vector<8x128xf32> to vector<8x32xf32>
    %472 = math.tanh %471 : vector<8x32xf32>
    %473 = vector.extract_strided_slice %458 {offsets = [0, 96], sizes = [8, 32], strides = [1, 1]} : vector<8x128xf32> to vector<8x32xf32>
    %474 = arith.negf %473 : vector<8x32xf32>
    %475 = math.exp %474 : vector<8x32xf32>
    %cst_167 = arith.constant 1.000000e+00 : f32
    %476 = vector.broadcast %cst_167 : f32 to vector<8x32xf32>
    %477 = arith.addf %476, %475 : vector<8x32xf32>
    %478 = arith.divf %476, %477 : vector<8x32xf32>
    %479 = arith.mulf %470, %446 : vector<8x32xf32>
    %480 = arith.mulf %464, %472 : vector<8x32xf32>
    %481 = arith.addf %479, %480 : vector<8x32xf32>
    %482 = math.tanh %481 : vector<8x32xf32>
    %483 = arith.mulf %478, %482 : vector<8x32xf32>
    %484 = arith.index_cast %452 : i32 to index
    %c0_168 = arith.constant 0 : index
    %485 = vector.load %arg12[%484, %c0_168] : memref<64x32xf32, #tpu.memory_space<vmem>>, vector<8x32xf32>
    tpu.vector_store %arg12[%484, %c0_168], %483 {strides = array<i32>} : memref<64x32xf32, #tpu.memory_space<vmem>>, vector<8x32xf32>,
    %c5_i32_169 = arith.constant 5 : i32
    %c8_i32_170 = arith.constant 8 : i32
    %486 = arith.muli %c5_i32_169, %c8_i32_170 : i32
    %487 = tpu.assume_multiple %486, 8 : i32
    %488 = arith.index_cast %487 : i32 to index
    %c0_171 = arith.constant 0 : index
    %489 = vector.load %arg13[%488, %c0_171] : memref<64x128xf32, #tpu.memory_space<vmem>>, vector<8x128xf32>
    %c1_172 = arith.constant 1 : index
    %c0_173 = arith.constant 0 : index
    %c0_174 = arith.constant 0 : index
    %490 = vector.load %arg3[%c1_172, %c0_173, %c0_174] : memref<2x32x128xf32, #tpu.memory_space<vmem>>, vector<1x32x128xf32>
    %491 = vector.shape_cast %490 : vector<1x32x128xf32> to vector<32x128xf32>
    %cst_175 = arith.constant dense<0.000000e+00> : vector<8x128xf32>
    %492 = tpu.matmul %483, %491, %cst_175 {dimension_numbers = #tpu.dot_dimension_numbers<[1], [0], [0], [1], [0, 0, 1, 1], [], []>} : vector<8x32xf32>, vector<32x128xf32>, vector<8x128xf32> -> vector<8x128xf32>
    %493 = arith.addf %489, %492 : vector<8x128xf32>
    %494 = vector.extract_strided_slice %493 {offsets = [0, 0], sizes = [8, 32], strides = [1, 1]} : vector<8x128xf32> to vector<8x32xf32>
    %495 = arith.negf %494 : vector<8x32xf32>
    %496 = math.exp %495 : vector<8x32xf32>
    %cst_176 = arith.constant 1.000000e+00 : f32
    %497 = vector.broadcast %cst_176 : f32 to vector<8x32xf32>
    %498 = arith.addf %497, %496 : vector<8x32xf32>
    %499 = arith.divf %497, %498 : vector<8x32xf32>
    %500 = vector.extract_strided_slice %493 {offsets = [0, 32], sizes = [8, 32], strides = [1, 1]} : vector<8x128xf32> to vector<8x32xf32>
    %501 = arith.negf %500 : vector<8x32xf32>
    %502 = math.exp %501 : vector<8x32xf32>
    %cst_177 = arith.constant 1.000000e+00 : f32
    %503 = vector.broadcast %cst_177 : f32 to vector<8x32xf32>
    %504 = arith.addf %503, %502 : vector<8x32xf32>
    %505 = arith.divf %503, %504 : vector<8x32xf32>
    %506 = vector.extract_strided_slice %493 {offsets = [0, 64], sizes = [8, 32], strides = [1, 1]} : vector<8x128xf32> to vector<8x32xf32>
    %507 = math.tanh %506 : vector<8x32xf32>
    %508 = vector.extract_strided_slice %493 {offsets = [0, 96], sizes = [8, 32], strides = [1, 1]} : vector<8x128xf32> to vector<8x32xf32>
    %509 = arith.negf %508 : vector<8x32xf32>
    %510 = math.exp %509 : vector<8x32xf32>
    %cst_178 = arith.constant 1.000000e+00 : f32
    %511 = vector.broadcast %cst_178 : f32 to vector<8x32xf32>
    %512 = arith.addf %511, %510 : vector<8x32xf32>
    %513 = arith.divf %511, %512 : vector<8x32xf32>
    %514 = arith.mulf %505, %481 : vector<8x32xf32>
    %515 = arith.mulf %499, %507 : vector<8x32xf32>
    %516 = arith.addf %514, %515 : vector<8x32xf32>
    %517 = math.tanh %516 : vector<8x32xf32>
    %518 = arith.mulf %513, %517 : vector<8x32xf32>
    %519 = arith.index_cast %487 : i32 to index
    %c0_179 = arith.constant 0 : index
    %520 = vector.load %arg12[%519, %c0_179] : memref<64x32xf32, #tpu.memory_space<vmem>>, vector<8x32xf32>
    tpu.vector_store %arg12[%519, %c0_179], %518 {strides = array<i32>} : memref<64x32xf32, #tpu.memory_space<vmem>>, vector<8x32xf32>,
    %c6_i32_180 = arith.constant 6 : i32
    %c8_i32_181 = arith.constant 8 : i32
    %521 = arith.muli %c6_i32_180, %c8_i32_181 : i32
    %522 = tpu.assume_multiple %521, 8 : i32
    %523 = arith.index_cast %522 : i32 to index
    %c0_182 = arith.constant 0 : index
    %524 = vector.load %arg13[%523, %c0_182] : memref<64x128xf32, #tpu.memory_space<vmem>>, vector<8x128xf32>
    %c1_183 = arith.constant 1 : index
    %c0_184 = arith.constant 0 : index
    %c0_185 = arith.constant 0 : index
    %525 = vector.load %arg3[%c1_183, %c0_184, %c0_185] : memref<2x32x128xf32, #tpu.memory_space<vmem>>, vector<1x32x128xf32>
    %526 = vector.shape_cast %525 : vector<1x32x128xf32> to vector<32x128xf32>
    %cst_186 = arith.constant dense<0.000000e+00> : vector<8x128xf32>
    %527 = tpu.matmul %518, %526, %cst_186 {dimension_numbers = #tpu.dot_dimension_numbers<[1], [0], [0], [1], [0, 0, 1, 1], [], []>} : vector<8x32xf32>, vector<32x128xf32>, vector<8x128xf32> -> vector<8x128xf32>
    %528 = arith.addf %524, %527 : vector<8x128xf32>
    %529 = vector.extract_strided_slice %528 {offsets = [0, 0], sizes = [8, 32], strides = [1, 1]} : vector<8x128xf32> to vector<8x32xf32>
    %530 = arith.negf %529 : vector<8x32xf32>
    %531 = math.exp %530 : vector<8x32xf32>
    %cst_187 = arith.constant 1.000000e+00 : f32
    %532 = vector.broadcast %cst_187 : f32 to vector<8x32xf32>
    %533 = arith.addf %532, %531 : vector<8x32xf32>
    %534 = arith.divf %532, %533 : vector<8x32xf32>
    %535 = vector.extract_strided_slice %528 {offsets = [0, 32], sizes = [8, 32], strides = [1, 1]} : vector<8x128xf32> to vector<8x32xf32>
    %536 = arith.negf %535 : vector<8x32xf32>
    %537 = math.exp %536 : vector<8x32xf32>
    %cst_188 = arith.constant 1.000000e+00 : f32
    %538 = vector.broadcast %cst_188 : f32 to vector<8x32xf32>
    %539 = arith.addf %538, %537 : vector<8x32xf32>
    %540 = arith.divf %538, %539 : vector<8x32xf32>
    %541 = vector.extract_strided_slice %528 {offsets = [0, 64], sizes = [8, 32], strides = [1, 1]} : vector<8x128xf32> to vector<8x32xf32>
    %542 = math.tanh %541 : vector<8x32xf32>
    %543 = vector.extract_strided_slice %528 {offsets = [0, 96], sizes = [8, 32], strides = [1, 1]} : vector<8x128xf32> to vector<8x32xf32>
    %544 = arith.negf %543 : vector<8x32xf32>
    %545 = math.exp %544 : vector<8x32xf32>
    %cst_189 = arith.constant 1.000000e+00 : f32
    %546 = vector.broadcast %cst_189 : f32 to vector<8x32xf32>
    %547 = arith.addf %546, %545 : vector<8x32xf32>
    %548 = arith.divf %546, %547 : vector<8x32xf32>
    %549 = arith.mulf %540, %516 : vector<8x32xf32>
    %550 = arith.mulf %534, %542 : vector<8x32xf32>
    %551 = arith.addf %549, %550 : vector<8x32xf32>
    %552 = math.tanh %551 : vector<8x32xf32>
    %553 = arith.mulf %548, %552 : vector<8x32xf32>
    %554 = arith.index_cast %522 : i32 to index
    %c0_190 = arith.constant 0 : index
    %555 = vector.load %arg12[%554, %c0_190] : memref<64x32xf32, #tpu.memory_space<vmem>>, vector<8x32xf32>
    tpu.vector_store %arg12[%554, %c0_190], %553 {strides = array<i32>} : memref<64x32xf32, #tpu.memory_space<vmem>>, vector<8x32xf32>,
    %c7_i32_191 = arith.constant 7 : i32
    %c8_i32_192 = arith.constant 8 : i32
    %556 = arith.muli %c7_i32_191, %c8_i32_192 : i32
    %557 = tpu.assume_multiple %556, 8 : i32
    %558 = arith.index_cast %557 : i32 to index
    %c0_193 = arith.constant 0 : index
    %559 = vector.load %arg13[%558, %c0_193] : memref<64x128xf32, #tpu.memory_space<vmem>>, vector<8x128xf32>
    %c1_194 = arith.constant 1 : index
    %c0_195 = arith.constant 0 : index
    %c0_196 = arith.constant 0 : index
    %560 = vector.load %arg3[%c1_194, %c0_195, %c0_196] : memref<2x32x128xf32, #tpu.memory_space<vmem>>, vector<1x32x128xf32>
    %561 = vector.shape_cast %560 : vector<1x32x128xf32> to vector<32x128xf32>
    %cst_197 = arith.constant dense<0.000000e+00> : vector<8x128xf32>
    %562 = tpu.matmul %553, %561, %cst_197 {dimension_numbers = #tpu.dot_dimension_numbers<[1], [0], [0], [1], [0, 0, 1, 1], [], []>} : vector<8x32xf32>, vector<32x128xf32>, vector<8x128xf32> -> vector<8x128xf32>
    %563 = arith.addf %559, %562 : vector<8x128xf32>
    %564 = vector.extract_strided_slice %563 {offsets = [0, 0], sizes = [8, 32], strides = [1, 1]} : vector<8x128xf32> to vector<8x32xf32>
    %565 = arith.negf %564 : vector<8x32xf32>
    %566 = math.exp %565 : vector<8x32xf32>
    %cst_198 = arith.constant 1.000000e+00 : f32
    %567 = vector.broadcast %cst_198 : f32 to vector<8x32xf32>
    %568 = arith.addf %567, %566 : vector<8x32xf32>
    %569 = arith.divf %567, %568 : vector<8x32xf32>
    %570 = vector.extract_strided_slice %563 {offsets = [0, 32], sizes = [8, 32], strides = [1, 1]} : vector<8x128xf32> to vector<8x32xf32>
    %571 = arith.negf %570 : vector<8x32xf32>
    %572 = math.exp %571 : vector<8x32xf32>
    %cst_199 = arith.constant 1.000000e+00 : f32
    %573 = vector.broadcast %cst_199 : f32 to vector<8x32xf32>
    %574 = arith.addf %573, %572 : vector<8x32xf32>
    %575 = arith.divf %573, %574 : vector<8x32xf32>
    %576 = vector.extract_strided_slice %563 {offsets = [0, 64], sizes = [8, 32], strides = [1, 1]} : vector<8x128xf32> to vector<8x32xf32>
    %577 = math.tanh %576 : vector<8x32xf32>
    %578 = vector.extract_strided_slice %563 {offsets = [0, 96], sizes = [8, 32], strides = [1, 1]} : vector<8x128xf32> to vector<8x32xf32>
    %579 = arith.negf %578 : vector<8x32xf32>
    %580 = math.exp %579 : vector<8x32xf32>
    %cst_200 = arith.constant 1.000000e+00 : f32
    %581 = vector.broadcast %cst_200 : f32 to vector<8x32xf32>
    %582 = arith.addf %581, %580 : vector<8x32xf32>
    %583 = arith.divf %581, %582 : vector<8x32xf32>
    %584 = arith.mulf %575, %551 : vector<8x32xf32>
    %585 = arith.mulf %569, %577 : vector<8x32xf32>
    %586 = arith.addf %584, %585 : vector<8x32xf32>
    %587 = math.tanh %586 : vector<8x32xf32>
    %588 = arith.mulf %583, %587 : vector<8x32xf32>
    %589 = arith.index_cast %557 : i32 to index
    %c0_201 = arith.constant 0 : index
    %590 = vector.load %arg12[%589, %c0_201] : memref<64x32xf32, #tpu.memory_space<vmem>>, vector<8x32xf32>
    tpu.vector_store %arg12[%589, %c0_201], %588 {strides = array<i32>} : memref<64x32xf32, #tpu.memory_space<vmem>>, vector<8x32xf32>,
    %c8_i32_202 = arith.constant 8 : i32
    %c1_203 = arith.constant 1 : index
    %c0_204 = arith.constant 0 : index
    %c0_205 = arith.constant 0 : index
    %591 = vector.load %arg10[%c1_203, %c0_204, %c0_205] : memref<2x8x32xf32, #tpu.memory_space<vmem>>, vector<1x8x32xf32>
    %592 = vector.shape_cast %591 : vector<1x8x32xf32> to vector<8x32xf32>
    %593 = vector.shape_cast %588 : vector<8x32xf32> to vector<1x8x32xf32>
    tpu.vector_store %arg10[%c1_203, %c0_204, %c0_205], %593 {strides = array<i32>} : memref<2x8x32xf32, #tpu.memory_space<vmem>>, vector<1x8x32xf32>,
    %c1_206 = arith.constant 1 : index
    %c0_207 = arith.constant 0 : index
    %c0_208 = arith.constant 0 : index
    %594 = vector.load %arg11[%c1_206, %c0_207, %c0_208] : memref<2x8x32xf32, #tpu.memory_space<vmem>>, vector<1x8x32xf32>
    %595 = vector.shape_cast %594 : vector<1x8x32xf32> to vector<8x32xf32>
    %596 = vector.shape_cast %586 : vector<8x32xf32> to vector<1x8x32xf32>
    tpu.vector_store %arg11[%c1_206, %c0_207, %c0_208], %596 {strides = array<i32>} : memref<2x8x32xf32, #tpu.memory_space<vmem>>, vector<1x8x32xf32>,
    %c0_209 = arith.constant 0 : index
    %c0_210 = arith.constant 0 : index
    %597 = vector.load %arg12[%c0_209, %c0_210] : memref<64x32xf32, #tpu.memory_space<vmem>>, vector<64x32xf32>
    %c0_211 = arith.constant 0 : index
    %c0_212 = arith.constant 0 : index
    %598 = vector.load %arg7[%c0_211, %c0_212] : memref<32x128xf32, #tpu.memory_space<vmem>>, vector<32x128xf32>
    %cst_213 = arith.constant dense<0.000000e+00> : vector<64x128xf32>
    %599 = tpu.matmul %597, %598, %cst_213 {dimension_numbers = #tpu.dot_dimension_numbers<[1], [0], [0], [1], [0, 0, 1, 1], [], []>} : vector<64x32xf32>, vector<32x128xf32>, vector<64x128xf32> -> vector<64x128xf32>
    %c0_214 = arith.constant 0 : index
    %c0_215 = arith.constant 0 : index
    %600 = vector.load %arg8[%c0_214, %c0_215] : memref<1x128xf32, #tpu.memory_space<vmem>>, vector<1x128xf32>
    %601 = vector.broadcast %600 : vector<1x128xf32> to vector<64x128xf32>
    %602 = arith.addf %599, %601 : vector<64x128xf32>
    %c0_216 = arith.constant 0 : index
    %c0_217 = arith.constant 0 : index
    %603 = vector.load %arg9[%c0_216, %c0_217] : memref<64x128xf32, #tpu.memory_space<vmem>>, vector<64x128xf32>
    tpu.vector_store %arg9[%c0_216, %c0_217], %602 {strides = array<i32>} : memref<64x128xf32, #tpu.memory_space<vmem>>, vector<64x128xf32>,
    return
  }
  func.func @transform_0(%arg0: i32) -> (i32, i32, i32) {
    %c0_i32 = arith.constant 0 : i32
    %c0_i32_0 = arith.constant 0 : i32
    %c0_i32_1 = arith.constant 0 : i32
    %c0_i32_2 = arith.constant 0 : i32
    return %c0_i32, %c0_i32_0, %c0_i32_1 : i32, i32, i32
  }
  func.func @transform_1(%arg0: i32) -> (i32, i32, i32) {
    %c0_i32 = arith.constant 0 : i32
    %c0_i32_0 = arith.constant 0 : i32
    %c0_i32_1 = arith.constant 0 : i32
    %c0_i32_2 = arith.constant 0 : i32
    return %c0_i32, %c0_i32_0, %c0_i32_1 : i32, i32, i32
  }
  func.func @transform_2(%arg0: i32) -> (i32, i32, i32) {
    %c0_i32 = arith.constant 0 : i32
    %c0_i32_0 = arith.constant 0 : i32
    %c0_i32_1 = arith.constant 0 : i32
    %c0_i32_2 = arith.constant 0 : i32
    return %c0_i32, %c0_i32_0, %c0_i32_1 : i32, i32, i32
  }
  func.func @transform_3(%arg0: i32) -> (i32, i32, i32) {
    %c0_i32 = arith.constant 0 : i32
    %c0_i32_0 = arith.constant 0 : i32
    %c0_i32_1 = arith.constant 0 : i32
    %c0_i32_2 = arith.constant 0 : i32
    return %c0_i32, %c0_i32_0, %c0_i32_1 : i32, i32, i32
  }
  func.func @transform_4(%arg0: i32) -> (i32, i32, i32) {
    %c0_i32 = arith.constant 0 : i32
    %c0_i32_0 = arith.constant 0 : i32
    %c0_i32_1 = arith.constant 0 : i32
    %c0_i32_2 = arith.constant 0 : i32
    return %c0_i32, %c0_i32_0, %c0_i32_1 : i32, i32, i32
  }
  func.func @transform_5(%arg0: i32) -> (i32, i32, i32) {
    %c0_i32 = arith.constant 0 : i32
    %c0_i32_0 = arith.constant 0 : i32
    %c0_i32_1 = arith.constant 0 : i32
    %c0_i32_2 = arith.constant 0 : i32
    return %c0_i32, %c0_i32_0, %c0_i32_1 : i32, i32, i32
  }
  func.func @transform_6(%arg0: i32) -> (i32, i32) {
    %c0_i32 = arith.constant 0 : i32
    %c0_i32_0 = arith.constant 0 : i32
    %c0_i32_1 = arith.constant 0 : i32
    return %c0_i32, %c0_i32_0 : i32, i32
  }
  func.func @transform_7(%arg0: i32) -> (i32, i32) {
    %c0_i32 = arith.constant 0 : i32
    %c0_i32_0 = arith.constant 0 : i32
    %c0_i32_1 = arith.constant 0 : i32
    return %c0_i32, %c0_i32_0 : i32, i32
  }
  func.func @transform_8(%arg0: i32) -> (i32, i32) {
    %c0_i32 = arith.constant 0 : i32
    %c0_i32_0 = arith.constant 0 : i32
    %c0_i32_1 = arith.constant 0 : i32
    return %c0_i32, %c0_i32_0 : i32, i32
  }
  func.func @transform_9(%arg0: i32) -> (i32, i32, i32) {
    %c0_i32 = arith.constant 0 : i32
    %c0_i32_0 = arith.constant 0 : i32
    %c0_i32_1 = arith.constant 0 : i32
    %c0_i32_2 = arith.constant 0 : i32
    return %c0_i32, %c0_i32_0, %c0_i32_1 : i32, i32, i32
  }
  func.func @transform_10(%arg0: i32) -> (i32, i32, i32) {
    %c0_i32 = arith.constant 0 : i32
    %c0_i32_0 = arith.constant 0 : i32
    %c0_i32_1 = arith.constant 0 : i32
    %c0_i32_2 = arith.constant 0 : i32
    return %c0_i32, %c0_i32_0, %c0_i32_1 : i32, i32, i32
  }
}

</mosaic_0001>

<bundles_post_ra>
// kernel: rnn_forward.1
= control target key start
LH: loop header
LB: loop body
LE: loop exit
PB: predicated region body
PF: predicated region fallthrough
CT: control target
= control target key end

     0   :  { %16 = vsyncpa [#allocation5], 0  ;;  %s3683_s0 = inlined_call_operand.hbm [shape: f32[8,8,128], index: 0, kind: input, shape index: {}]   ;;  %s3684_s1 = inlined_call_operand.hbm [shape: f32[1,32,128], index: 1, kind: input, shape index: {}]   ;;  %s3685_s2 = inlined_call_operand.hbm [shape: f32[2,32,128], index: 2, kind: input, shape index: {}]   ;;  %s3686_s3 = inlined_call_operand.hbm [shape: f32[1,1,128], index: 3, kind: input, shape index: {}]   ;;  %s3687_s4 = inlined_call_operand.hbm [shape: f32[2,8,32], index: 4, kind: input, shape index: {}]   ;;  %s3688_s5 = inlined_call_operand.hbm [shape: f32[2,8,32], index: 5, kind: input, shape index: {}]   ;;  %s3689_s6 = inlined_call_operand.hbm [shape: f32[32,128], index: 6, kind: input, shape index: {}]   ;;  %s3690_s7 = inlined_call_operand.hbm [shape: f32[1,128], index: 7, kind: input, shape index: {}]   ;;  %s3691_s8 = inlined_call_operand.hbm [shape: f32[64,128], index: 8, kind: output, shape index: {0}]   ;;  %s3692_s9 = inlined_call_operand.hbm [shape: f32[2,8,32], index: 9, kind: output, shape index: {1}]   ;;  %s3693_s10 = inlined_call_operand.hbm [shape: f32[2,8,32], index: 10, kind: output, shape index: {2}]  }
   0x1   :  { %17 = vsyncpa [#allocation8], 0 }
   0x2   :  { %18 = vsyncpa [#allocation11], 0 }
   0x3   :  { %19 = vsyncpa [#allocation14], 0 }
   0x4   :  { %20 = vsyncpa [#allocation17], 0 }
   0x5   :  { %21 = vsyncpa [#allocation6], 0 }
   0x6   :  { %22 = vsyncpa [#allocation20], 0  ;;  %s3153_s13 = smov [#allocation7]   ;;  %s3154_s15 = smov [#allocation10]  }
   0x7   :  { %s40_s14 = sshll.u32 %s3153_s13, 4  ;;  %s65_s16 = sshll.u32 %s3154_s15, 4  ;;  %s41_s14 = int_to_ptr.vmem [resolvable:$true] %s40_s14  ;;  %s3227_s16 = int_to_ptr.vmem [resolvable:$true] %s65_s16 }
   0x8   :  { %s2897_s19 = scalar_lea.hbm %s3684_s1, 512 }
   0x9   :  { %p2898_p0 = scmp.ne.s32.totalorder %s3684_s1, %s2897_s19  ;;  %p2901_p1 = scmp.lt.u32.totalorder %s2897_s19, %s3684_s1 }
   0xb   :  { %p2903_p2 = pnand %p2901_p1, %p2898_p0 }
   0xd   :  { %2906 = shalt.err (!%p2903_p2)
}
   0xe   :  { %s2907_s24 = scalar_lea.vmem %s41_s14, 512  ;;  %p2912_p4 = scmp.lt.s32.totalorder %s41_s14, %s41_s14 }
   0xf   :  { %p2908_p3 = scmp.ne.s32.totalorder %s41_s14, %s2907_s24  ;;  %p2913_p5 = scmp.lt.s32.totalorder %s2907_s24, %s2907_s24 }
  0x11   :  { %p2914_p6 = por %p2913_p5, %p2912_p4 }
  0x13   :  { %p2915_p7 = pnand %p2914_p6, %p2908_p3 }
  0x15   :  { %2918 = shalt.err (!%p2915_p7)
}
  0x16   :  { %s3155_s25 = smov 128   ;;  %s3156_s26 = smov 8  }
  0x17   :  { %46 = dma.hbm_to_vmem [thread:$0]  %s3684_s1, 512, %s41_s14, [#allocation8], %s3155_s25, %s3155_s25, %s3156_s26  }
  0x18   :  { %s2919_s11 = scalar_lea.hbm %s3686_s3, 16 }
  0x19   :  { %p2920_p8 = scmp.ne.s32.totalorder %s3686_s3, %s2919_s11  ;;  %p2923_p9 = scmp.lt.u32.totalorder %s2919_s11, %s3686_s3 }
  0x1b   :  { %p2925_p10 = pnand %p2923_p9, %p2920_p8 }
  0x1d   :  { %2928 = shalt.err (!%p2925_p10)
}
  0x1e   :  { %s2929_s18 = scalar_lea.vmem %s3227_s16, 16  ;;  %s2933_s1 = scalar_lea.vmem %s3227_s16, 32 }
  0x1f   :  { %p2930_p11 = scmp.ne.s32.totalorder %s3227_s16, %s2929_s18  ;;  %p2934_p12 = scmp.lt.s32.totalorder %s3227_s16, %s3227_s16 }
  0x20   :  { %p2935_p13 = scmp.lt.s32.totalorder %s2933_s1, %s2929_s18 }
  0x22   :  { %p2936_p0 = por %p2935_p13, %p2934_p12 }
  0x24   :  { %p2937_p1 = pnand %p2936_p0, %p2930_p11 }
  0x26   :  { %2940 = shalt.err (!%p2937_p1)
}
  0x27   :  { %68 = dma.hbm_to_vmem [thread:$0]  %s3686_s3, 16, %s3227_s16, [#allocation11]  }
  0x28   :  { %s3157_s20 = smov [#allocation13]   ;;  %s3158_s22 = smov [#allocation4]  }
  0x29   :  { %s86_s21 = sshll.u32 %s3157_s20, 4  ;;  %s28_s23 = sshll.u32 %s3158_s22, 4  ;;  %s87_s21 = int_to_ptr.vmem [resolvable:$true] %s86_s21  ;;  %s3262_s23 = int_to_ptr.vmem [resolvable:$true] %s28_s23 }
  0x2a   :  { %s2941_s28 = scalar_lea.hbm %s3688_s5, 256 }
  0x2b   :  { %p2942_p2 = scmp.ne.s32.totalorder %s3688_s5, %s2941_s28  ;;  %p2945_p3 = scmp.lt.u32.totalorder %s2941_s28, %s3688_s5 }
  0x2d   :  { %p2947_p4 = pnand %p2945_p3, %p2942_p2 }
  0x2f   :  { %2950 = shalt.err (!%p2947_p4)
}
  0x30   :  { %s2951_s3 = scalar_lea.vmem %s87_s21, 256  ;;  %p2956_p6 = scmp.lt.s32.totalorder %s87_s21, %s87_s21 }
  0x31   :  { %p2952_p5 = scmp.ne.s32.totalorder %s87_s21, %s2951_s3  ;;  %p2957_p7 = scmp.lt.s32.totalorder %s2951_s3, %s2951_s3 }
  0x33   :  { %p2958_p8 = por %p2957_p7, %p2956_p6 }
  0x35   :  { %p2959_p9 = pnand %p2958_p8, %p2952_p5 }
  0x37   :  { %2962 = shalt.err (!%p2959_p9)
}
  0x38   :  { %92 = dma.hbm_to_vmem [thread:$0]  %s3688_s5, 256, %s87_s21, [#allocation14], %s3155_s25, %s3155_s25, %s3156_s26  }
  0x39   :  { %s2963_s18 = scalar_lea.hbm %s3683_s0, 1024 }
  0x3a   :  { %p2964_p10 = scmp.ne.s32.totalorder %s3683_s0, %s2963_s18  ;;  %p2967_p11 = scmp.lt.u32.totalorder %s2963_s18, %s3683_s0 }
  0x3c   :  { %p2969_p12 = pnand %p2967_p11, %p2964_p10 }
  0x3e   :  { %2972 = shalt.err (!%p2969_p12)
}
  0x3f   :  { %s2973_s22 = scalar_lea.vmem %s3262_s23, 1024  ;;  %p2978_p0 = scmp.lt.s32.totalorder %s3262_s23, %s3262_s23 }
  0x40   :  { %p2974_p13 = scmp.ne.s32.totalorder %s3262_s23, %s2973_s22  ;;  %p2979_p1 = scmp.lt.s32.totalorder %s2973_s22, %s2973_s22 }
  0x42   :  { %p2980_p2 = por %p2979_p1, %p2978_p0 }
  0x44   :  { %p2981_p3 = pnand %p2980_p2, %p2974_p13 }
  0x46   :  { %2984 = shalt.err (!%p2981_p3)
}
  0x47   :  { %34 = dma.hbm_to_vmem [thread:$0]  %s3683_s0, 1024, %s3262_s23, [#allocation5], %s3155_s25, %s3155_s25, %s3156_s26  }
  0x48   :  { %s3159_s24 = smov [#allocation9]   ;;  %s3160_s28 = smov [#allocation12]  }
  0x49   :  { %s52_s27 = sshll.u32 %s3159_s24, 4  ;;  %s74_s29 = sshll.u32 %s3160_s28, 4  ;;  %s53_s27 = int_to_ptr.vmem [resolvable:$true] %s52_s27  ;;  %s3299_s29 = int_to_ptr.vmem [resolvable:$true] %s74_s29 }
  0x4a   :  { %s2985_s12 = scalar_lea.hbm %s3685_s2, 1024 }
  0x4b   :  { %p2986_p4 = scmp.ne.s32.totalorder %s3685_s2, %s2985_s12  ;;  %p2989_p5 = scmp.lt.u32.totalorder %s2985_s12, %s3685_s2 }
  0x4d   :  { %p2991_p6 = pnand %p2989_p5, %p2986_p4 }
  0x4f   :  { %2994 = shalt.err (!%p2991_p6)
}
  0x50   :  { %s2995_s0 = scalar_lea.vmem %s53_s27, 1024  ;;  %p3000_p8 = scmp.lt.s32.totalorder %s53_s27, %s53_s27 }
  0x51   :  { %p2996_p7 = scmp.ne.s32.totalorder %s53_s27, %s2995_s0  ;;  %p3001_p9 = scmp.lt.s32.totalorder %s2995_s0, %s2995_s0 }
  0x53   :  { %p3002_p10 = por %p3001_p9, %p3000_p8 }
  0x55   :  { %p3003_p11 = pnand %p3002_p10, %p2996_p7 }
  0x57   :  { %3006 = shalt.err (!%p3003_p11)
}
  0x58   :  { %58 = dma.hbm_to_vmem [thread:$0]  %s3685_s2, 1024, %s53_s27, [#allocation8], %s3155_s25, %s3155_s25, %s3156_s26  }
  0x59   :  { %s3007_s14 = scalar_lea.hbm %s3687_s4, 256 }
  0x5a   :  { %p3008_p12 = scmp.ne.s32.totalorder %s3687_s4, %s3007_s14  ;;  %p3011_p13 = scmp.lt.u32.totalorder %s3007_s14, %s3687_s4 }
  0x5c   :  { %p3013_p0 = pnand %p3011_p13, %p3008_p12 }
  0x5e   :  { %3016 = shalt.err (!%p3013_p0)
}
  0x5f   :  { %s3017_s21 = scalar_lea.vmem %s3299_s29, 256  ;;  %p3022_p2 = scmp.lt.s32.totalorder %s3299_s29, %s3299_s29 }
  0x60   :  { %p3018_p1 = scmp.ne.s32.totalorder %s3299_s29, %s3017_s21  ;;  %p3023_p3 = scmp.lt.s32.totalorder %s3017_s21, %s3017_s21 }
  0x62   :  { %p3024_p4 = por %p3023_p3, %p3022_p2 }
  0x64   :  { %p3025_p5 = pnand %p3024_p4, %p3018_p1 }
  0x66   :  { %3028 = shalt.err (!%p3025_p5)
}
  0x67   :  { %80 = dma.hbm_to_vmem [thread:$0]  %s3687_s4, 256, %s3299_s29, [#allocation11], %s3155_s25, %s3155_s25, %s3156_s26  }
  0x68   :  { %s3161_s27 = smov [#allocation15]   ;;  %s3162_s30 = smov [#allocation16]  }
  0x69   :  { %s98_s28 = sshll.u32 %s3161_s27, 4  ;;  %s111_s11 = sshll.u32 %s3162_s30, 4  ;;  %s99_s28 = int_to_ptr.vmem [resolvable:$true] %s98_s28  ;;  %s112_s11 = int_to_ptr.vmem [resolvable:$true] %s111_s11 }
  0x6a   :  { %s3029_s16 = scalar_lea.hbm %s3689_s6, 512 }
  0x6b   :  { %p3030_p6 = scmp.ne.s32.totalorder %s3689_s6, %s3029_s16  ;;  %p3033_p7 = scmp.lt.u32.totalorder %s3029_s16, %s3689_s6 }
  0x6d   :  { %p3035_p8 = pnand %p3033_p7, %p3030_p6 }
  0x6f   :  { %3038 = shalt.err (!%p3035_p8)
}
  0x70   :  { %s3039_s4 = scalar_lea.vmem %s99_s28, 512  ;;  %p3044_p10 = scmp.lt.s32.totalorder %s99_s28, %s99_s28 }
  0x71   :  { %p3040_p9 = scmp.ne.s32.totalorder %s99_s28, %s3039_s4  ;;  %p3045_p11 = scmp.lt.s32.totalorder %s3039_s4, %s3039_s4 }
  0x73   :  { %p3046_p12 = por %p3045_p11, %p3044_p10 }
  0x75   :  { %p3047_p13 = pnand %p3046_p12, %p3040_p9 }
  0x77   :  { %3050 = shalt.err (!%p3047_p13)
}
  0x78   :  { %104 = dma.hbm_to_vmem [thread:$0]  %s3689_s6, 512, %s99_s28, [#allocation14], %s3155_s25, %s3155_s25, %s3156_s26  }
  0x79   :  { %s3051_s14 = scalar_lea.hbm %s3690_s7, 16 }
  0x7a   :  { %p3052_p0 = scmp.ne.s32.totalorder %s3690_s7, %s3051_s14  ;;  %p3055_p1 = scmp.lt.u32.totalorder %s3051_s14, %s3690_s7 }
  0x7c   :  { %p3057_p2 = pnand %p3055_p1, %p3052_p0 }
  0x7e   :  { %3060 = shalt.err (!%p3057_p2)
}
  0x7f   :  { %s3061_s21 = scalar_lea.vmem %s112_s11, 16  ;;  %s3065_s2 = scalar_lea.vmem %s112_s11, 32 }
  0x80   :  { %p3062_p3 = scmp.ne.s32.totalorder %s112_s11, %s3061_s21  ;;  %p3066_p4 = scmp.lt.s32.totalorder %s112_s11, %s112_s11 }
  0x81   :  { %p3067_p5 = scmp.lt.s32.totalorder %s3065_s2, %s3061_s21 }
  0x83   :  { %p3068_p6 = por %p3067_p5, %p3066_p4 }
  0x85   :  { %p3069_p7 = pnand %p3068_p6, %p3062_p3 }
  0x87   :  { %3072 = shalt.err (!%p3069_p7)
}
  0x88   :  { %114 = dma.hbm_to_vmem [thread:$0]  %s3690_s7, 16, %s112_s11, [#allocation17]  }
  0x89   :  { %3139 = dma.done.wait [#allocation5], 1024  }
  0x8a   :  { %3140 = vsyncadd [#allocation5], 4294966272 }
  0x8b   :  { %3141 = dma.done.wait [#allocation8], 1536  }
  0x8c   :  { %3142 = vsyncadd [#allocation8], 4294965760 }
  0x8d   :  { %3143 = dma.done.wait [#allocation11], 272  }
  0x8e   :  { %3144 = vsyncadd [#allocation11], 4294967024 }
  0x8f   :  { %3145 = dma.done.wait [#allocation14], 768  }
  0x90   :  { %3146 = vsyncadd [#allocation14], 4294966528 }
  0x91   :  { %3147 = dma.done.wait [#allocation17], 16  }
  0x92   :  { %3148 = vsyncadd [#allocation17], 4294967280  ;;  %v3163_v0 = vmov 0.0|0.0   ;;  %vm3164_vm0 = vmmov 0   ;;  %v3165_v1 = vmov 0.0   ;;  %v142_v2 = vld [vmem:[#allocation9] sm:$0xff] }
  0x93   :  { %2638 = vmatprep.subr.bf16.mxu1 %v3163_v0  ;;  %2430 = vmatprep.mubr.msk.f32.mxu1 %vm3164_vm0, %v3165_v1  ;;  %v143_v3 = vld [vmem:[#allocation9 + $0x8] sm:$0xff]  ;;  %v144_v4 = vld [vmem:[#allocation9 + $0x10] sm:$0xff]  ;;  %v145_v6 = vld [vmem:[#allocation9 + $0x18] sm:$0xff]  ;;  %vm146_vm1 = vcmask 261120   ;;  %s3166_s7 = smov 64   ;;  %s3167_s27 = smov 32  }
  0x94   :  { %2650 = vmatprep.subr.bf16.mxu0 %v3163_v0  ;;  %2452 = vmatprep.mubr.msk.f32.mxu0 %vm3164_vm0, %v3165_v1  ;;  %v3369_v5 = vpack.c.bf16 %v143_v3, %v142_v2  ;;  %v3372_v7 = vpack.c.bf16 %v145_v6, %v144_v4  ;;  %v139_v8 = vld [vmem:[#allocation12] sm:$0xff]  ;;  %v140_v14 = vld [vmem:[#allocation13] sm:$0xff]  ;;  %s3168_s28 = smov 96   ;;  %s3169_s30 = smov [#allocation19]  }
  0x95   :  { %v141_v9 = vld [vmem:[#allocation4] sm:$0xff]  ;;  %v255_v29 = vld [vmem:[#allocation4 + $0x8] sm:$0xff]  ;;  %v364_v47 = vld [vmem:[#allocation4 + $0x10] sm:$0xff]  ;;  %s2233_s11 = sshll.u32 %s3169_s30, 4  ;;  %s2234_s11 = int_to_ptr.vmem [resolvable:$true] %s2233_s11 }
  0x96   :  { %2640 = vmatpush3.bf16.msra.mxu1 %v3369_v5  ;;  %2652 = vmatpush3.bf16.msra.mxu0 %v3369_v5  ;;  %v473_v3 = vld [vmem:[#allocation4 + $0x18] sm:$0xff]  ;;  %s3073_s12 = scalar_lea.vmem %s2234_s11, 256  ;;  %p3078_p9 = scmp.lt.s32.totalorder %s2234_s11, %s2234_s11 }
  0x97   :  { %2641 = vmatprep.subr.bf16.mxu1 %v3163_v0  ;;  %2653 = vmatprep.subr.bf16.mxu0 %v3163_v0  ;;  %p3074_p8 = scmp.ne.s32.totalorder %s2234_s11, %s3073_s12  ;;  %p3079_p10 = scmp.lt.s32.totalorder %s3073_s12, %s3073_s12 }
  0x99   :  { %p3080_p11 = por %p3079_p10, %p3078_p9 }
  0x9a   :  { %2643 = vmatpush3.bf16.msra.mxu1 %v3372_v7  ;;  %2655 = vmatpush3.bf16.msra.mxu0 %v3372_v7 }
  0x9b   :  { %2644 = vmatprep.subr.bf16.mxu1 %v3163_v0  ;;  %2662 = vmatprep.subr.bf16.mxu0 %v3163_v0  ;;  %p3081_p12 = pnand %p3080_p11, %p3074_p8 }
  0x9d   :  { %2431 = vmatmul.mubr.msk.f32.vlgmr.msra.gmra.mrb[0].mxu1 %vm146_vm1, %v139_v8 }
  0x9e   :  { %2646 = vmatpush3.bf16.msra.mxu1 %v3369_v5  ;;  %2441 = vmatprep.mubr.msk.f32.mxu1 %vm3164_vm0, %v3165_v1 }
  0x9f   :  { %2647 = vmatprep.subr.bf16.mxu1 %v3163_v0 }
  0xa2   :  { %2649 = vmatpush3.bf16.msra.mxu1 %v3372_v7 }
  0xa3   :  { %2656 = vmatprep.subr.bf16.mxu1 %v3163_v0 }
 0x170   :  { %v216_v10 = vpop.f32.mrb[0].mxu1 }
 0x171   :  { %v220_v11 = vadd.f32 %v216_v10, %v141_v9  ;;  %v2432_v12 = vpop.f32.mrb[1].mxu1 }
 0x173   :  { %2769 = vtanh.f32 %v220_v11  ;;  %v2269_v15 = vmul.f32 -1.442695, %v220_v11 }
 0x175   :  { %2771 = vpow2.f32 %v2269_v15 }
 0x17d   :  { %v2770_v13 = vpop.eup %2769 }
 0x17e   :  { %234 = vrot.lane.b32.xlu0 %v2770_v13, %s3166_s7 }
 0x17f   :  { %v2772_v16 = vpop.eup %2771 }
 0x180   :  { %v224_v17 = vadd.f32 1.0, %v2772_v16 }
 0x182   :  { %229 = vrot.lane.b32.xlu0 %v140_v14, %s3167_s27  ;;  %2773 = vrcp.f32 %v224_v17 }
 0x18c   :  { %v2774_v18 = vpop.eup %2773 }
 0x1f0   :  { %v235_v19 = vpop.permute.xlu0 %234 }
 0x1f1   :  { %v237_v20 = vmul.f32 %v2774_v18, %v235_v19 }
 0x1f3   :  { %239 = vrot.lane.b32.xlu1 %v237_v20, %s3167_s27 }
 0x1f4   :  { %v230_v21 = vpop.permute.xlu0 %229 }
 0x1f5   :  { %v232_v22 = vmul.f32 %v2774_v18, %v230_v21 }
 0x265   :  { %v240_v23 = vpop.permute.xlu1 %239 }
 0x266   :  { %v242_v24 = vadd.f32 %v240_v23, %v232_v22  ;;  %v582_v23 = vld [vmem:[#allocation4 + $0x20] sm:$0xff] }
 0x268   :  { %2775 = vtanh.f32 %v242_v24 }
 0x272   :  { %v2776_v25 = vpop.eup %2775 }
 0x273   :  { %245 = vrot.lane.b32.xlu1 %v2776_v25, %s3166_s7 }
 0x2e5   :  { %v246_v26 = vpop.permute.xlu1 %245 }
 0x2e6   :  { %v248_v27 = vmul.f32 %v2774_v18, %v246_v26 }
 0x2e8   :  { %250 = vrot.lane.b32.xlu0 %v248_v27, %s3167_s27 }
 0x35a   :  { %v251_v28 = vpop.permute.xlu0 %250 }
 0x35b   :  { %253 = vst.msk [vmem:[#allocation2] sm:$0xff] %vm146_vm1, %v251_v28  ;;  %2442 = vmatmul.mubr.msk.f32.vlgmr.msra.gmra.mrb[2].mxu1 %vm146_vm1, %v251_v28 }
 0x35c   :  { %2658 = vmatpush3.bf16.msra.mxu1 %v3369_v5  ;;  %2463 = vmatprep.mubr.msk.f32.mxu1 %vm3164_vm0, %v3165_v1 }
 0x35d   :  { %2659 = vmatprep.subr.bf16.mxu1 %v3163_v0 }
 0x360   :  { %2661 = vmatpush3.bf16.msra.mxu1 %v3372_v7 }
 0x361   :  { %2668 = vmatprep.subr.bf16.mxu1 %v3163_v0 }
 0x42e   :  { %v328_v30 = vpop.f32.mrb[2].mxu1 }
 0x42f   :  { %v332_v31 = vadd.f32 %v328_v30, %v255_v29  ;;  %v2443_v32 = vpop.f32.mrb[3].mxu1 }
 0x431   :  { %2777 = vtanh.f32 %v332_v31  ;;  %v2271_v34 = vmul.f32 -1.442695, %v332_v31 }
 0x433   :  { %2779 = vpow2.f32 %v2271_v34 }
 0x43b   :  { %v2778_v33 = vpop.eup %2777 }
 0x43c   :  { %342 = vrot.lane.b32.xlu1 %v2778_v33, %s3166_s7 }
 0x43d   :  { %v2780_v35 = vpop.eup %2779 }
 0x43e   :  { %v336_v36 = vadd.f32 1.0, %v2780_v35 }
 0x440   :  { %2781 = vrcp.f32 %v336_v36 }
 0x44a   :  { %v2782_v37 = vpop.eup %2781 }
 0x44b   :  { %v340_v40 = vmul.f32 %v2782_v37, %v242_v24 }
 0x4ae   :  { %v343_v38 = vpop.permute.xlu1 %342 }
 0x4af   :  { %v345_v39 = vmul.f32 %v2782_v37, %v343_v38 }
 0x4b1   :  { %347 = vrot.lane.b32.xlu0 %v345_v39, %s3167_s27 }
 0x523   :  { %v348_v41 = vpop.permute.xlu0 %347 }
 0x524   :  { %v350_v42 = vadd.f32 %v348_v41, %v340_v40  ;;  %v691_v41 = vld [vmem:[#allocation4 + $0x28] sm:$0xff] }
 0x526   :  { %2783 = vtanh.f32 %v350_v42 }
 0x530   :  { %v2784_v43 = vpop.eup %2783 }
 0x531   :  { %353 = vrot.lane.b32.xlu1 %v2784_v43, %s3166_s7 }
 0x5a3   :  { %v354_v44 = vpop.permute.xlu1 %353 }
 0x5a4   :  { %v356_v45 = vmul.f32 %v2782_v37, %v354_v44 }
 0x5a6   :  { %358 = vrot.lane.b32.xlu0 %v356_v45, %s3167_s27 }
 0x618   :  { %v359_v46 = vpop.permute.xlu0 %358 }
 0x619   :  { %362 = vst.msk [vmem:[#allocation2 + $0x8] sm:$0xff] %vm146_vm1, %v359_v46  ;;  %2453 = vmatmul.mubr.msk.f32.vlgmr.msra.gmra.mrb[0].mxu0 %vm146_vm1, %v359_v46 }
 0x61a   :  { %2664 = vmatpush3.bf16.msra.mxu0 %v3369_v5  ;;  %2474 = vmatprep.mubr.msk.f32.mxu0 %vm3164_vm0, %v3165_v1 }
 0x61b   :  { %2665 = vmatprep.subr.bf16.mxu0 %v3163_v0 }
 0x61e   :  { %2667 = vmatpush3.bf16.msra.mxu0 %v3372_v7 }
 0x61f   :  { %2674 = vmatprep.subr.bf16.mxu0 %v3163_v0 }
 0x6ec   :  { %v437_v48 = vpop.f32.mrb[0].mxu0 }
 0x6ed   :  { %v441_v49 = vadd.f32 %v437_v48, %v364_v47  ;;  %v2454_v50 = vpop.f32.mrb[1].mxu0 }
 0x6ef   :  { %2785 = vtanh.f32 %v441_v49  ;;  %v2273_v52 = vmul.f32 -1.442695, %v441_v49 }
 0x6f1   :  { %2787 = vpow2.f32 %v2273_v52 }
 0x6f9   :  { %v2786_v51 = vpop.eup %2785 }
 0x6fa   :  { %451 = vrot.lane.b32.xlu1 %v2786_v51, %s3166_s7 }
 0x6fb   :  { %v2788_v53 = vpop.eup %2787 }
 0x6fc   :  { %v445_v54 = vadd.f32 1.0, %v2788_v53  ;;  %v1031_v53 = vld [vmem:[#allocation7] sm:$0xff] }
 0x6fe   :  { %2789 = vrcp.f32 %v445_v54  ;;  %v1032_v54 = vld [vmem:[#allocation7 + $0x8] sm:$0xff] }
 0x708   :  { %v2790_v55 = vpop.eup %2789 }
 0x709   :  { %v449_v58 = vmul.f32 %v2790_v55, %v350_v42 }
 0x76c   :  { %v452_v56 = vpop.permute.xlu1 %451 }
 0x76d   :  { %v454_v57 = vmul.f32 %v2790_v55, %v452_v56 }
 0x76f   :  { %456 = vrot.lane.b32.xlu0 %v454_v57, %s3167_s27 }
 0x7e1   :  { %v457_v59 = vpop.permute.xlu0 %456 }
 0x7e2   :  { %v459_v60 = vadd.f32 %v457_v59, %v449_v58  ;;  %v1033_v59 = vld [vmem:[#allocation7 + $0x10] sm:$0xff] }
 0x7e4   :  { %2791 = vtanh.f32 %v459_v60 }
 0x7ee   :  { %v2792_v61 = vpop.eup %2791 }
 0x7ef   :  { %462 = vrot.lane.b32.xlu1 %v2792_v61, %s3166_s7 }
 0x861   :  { %v463_v62 = vpop.permute.xlu1 %462 }
 0x862   :  { %v465_v63 = vmul.f32 %v2790_v55, %v463_v62  ;;  %v2686_v55 = vpack.c.bf16 %v1032_v54, %v1031_v53 }
 0x864   :  { %467 = vrot.lane.b32.xlu0 %v465_v63, %s3167_s27  ;;  %v1023_v63 = vld [vmem:[#allocation2] sm:$0xff] }
 0x8d6   :  { %v468_v2 = vpop.permute.xlu0 %467 }
 0x8d7   :  { %471 = vst.msk [vmem:[#allocation2 + $0x10] sm:$0xff] %vm146_vm1, %v468_v2  ;;  %2464 = vmatmul.mubr.msk.f32.vlgmr.msra.gmra.mrb[4].mxu1 %vm146_vm1, %v468_v2  ;;  %v1024_v2 = vld [vmem:[#allocation2 + $0x8] sm:$0xff] }
 0x8d8   :  { %2670 = vmatpush3.bf16.msra.mxu1 %v3369_v5  ;;  %2485 = vmatprep.mubr.msk.f32.mxu1 %vm3164_vm0, %v3165_v1 }
 0x8d9   :  { %2671 = vmatprep.subr.bf16.mxu1 %v3163_v0 }
 0x8dc   :  { %2673 = vmatpush3.bf16.msra.mxu1 %v3372_v7 }
 0x8dd   :  { %2680 = vmatprep.subr.bf16.mxu1 %v3163_v0 }
 0x9aa   :  { %v546_v4 = vpop.f32.mrb[4].mxu1 }
 0x9ab   :  { %v550_v6 = vadd.f32 %v546_v4, %v473_v3  ;;  %v2465_v8 = vpop.f32.mrb[5].mxu1  ;;  %v1025_v3 = vld [vmem:[#allocation2 + $0x10] sm:$0xff] }
 0x9ad   :  { %2793 = vtanh.f32 %v550_v6  ;;  %v2275_v10 = vmul.f32 -1.442695, %v550_v6 }
 0x9af   :  { %2795 = vpow2.f32 %v2275_v10 }
 0x9b7   :  { %v2794_v9 = vpop.eup %2793 }
 0x9b8   :  { %560 = vrot.lane.b32.xlu1 %v2794_v9, %s3166_s7  ;;  %v800_v9 = vld [vmem:[#allocation4 + $0x30] sm:$0xff] }
 0x9b9   :  { %v2796_v11 = vpop.eup %2795 }
 0x9ba   :  { %v554_v12 = vadd.f32 1.0, %v2796_v11 }
 0x9bc   :  { %2797 = vrcp.f32 %v554_v12 }
 0x9c6   :  { %v2798_v13 = vpop.eup %2797 }
 0x9c7   :  { %v558_v16 = vmul.f32 %v2798_v13, %v459_v60  ;;  %v1034_v60 = vld [vmem:[#allocation7 + $0x18] sm:$0xff] }
 0x9c8   :  { %v2690_v61 = vpack.c.bf16 %v1034_v60, %v1033_v59 }
 0xa2a   :  { %v561_v14 = vpop.permute.xlu1 %560 }
 0xa2b   :  { %v563_v15 = vmul.f32 %v2798_v13, %v561_v14 }
 0xa2d   :  { %565 = vrot.lane.b32.xlu0 %v563_v15, %s3167_s27 }
 0xa9f   :  { %v566_v17 = vpop.permute.xlu0 %565 }
 0xaa0   :  { %v568_v18 = vadd.f32 %v566_v17, %v558_v16 }
 0xaa2   :  { %2799 = vtanh.f32 %v568_v18 }
 0xaac   :  { %v2800_v19 = vpop.eup %2799 }
 0xaad   :  { %571 = vrot.lane.b32.xlu1 %v2800_v19, %s3166_s7 }
 0xb1f   :  { %v572_v20 = vpop.permute.xlu1 %571 }
 0xb20   :  { %v574_v21 = vmul.f32 %v2798_v13, %v572_v20 }
 0xb22   :  { %576 = vrot.lane.b32.xlu0 %v574_v21, %s3167_s27 }
 0xb94   :  { %v577_v22 = vpop.permute.xlu0 %576 }
 0xb95   :  { %580 = vst.msk [vmem:[#allocation2 + $0x18] sm:$0xff] %vm146_vm1, %v577_v22  ;;  %2475 = vmatmul.mubr.msk.f32.vlgmr.msra.gmra.mrb[2].mxu0 %vm146_vm1, %v577_v22 }
 0xb96   :  { %2676 = vmatpush3.bf16.msra.mxu0 %v3369_v5  ;;  %2496 = vmatprep.mubr.msk.f32.mxu0 %vm3164_vm0, %v3165_v1 }
 0xb97   :  { %2677 = vmatprep.subr.bf16.mxu0 %v3163_v0 }
 0xb9a   :  { %2679 = vmatpush3.bf16.msra.mxu0 %v3372_v7 }
 0xb9b   :  { %2687 = vmatprep.subr.bf16.mxu0 %v2686_v55 }
 0xb9c   :  { %v1026_v4 = vld [vmem:[#allocation2 + $0x18] sm:$0xff] }
 0xc68   :  { %v655_v24 = vpop.f32.mrb[2].mxu0 }
 0xc69   :  { %v659_v25 = vadd.f32 %v655_v24, %v582_v23  ;;  %v2476_v26 = vpop.f32.mrb[3].mxu0 }
 0xc6b   :  { %2801 = vtanh.f32 %v659_v25  ;;  %v2277_v28 = vmul.f32 -1.442695, %v659_v25 }
 0xc6d   :  { %2803 = vpow2.f32 %v2277_v28 }
 0xc75   :  { %v2802_v27 = vpop.eup %2801 }
 0xc76   :  { %669 = vrot.lane.b32.xlu1 %v2802_v27, %s3166_s7 }
 0xc77   :  { %v2804_v29 = vpop.eup %2803 }
 0xc78   :  { %v663_v30 = vadd.f32 1.0, %v2804_v29 }
 0xc7a   :  { %2805 = vrcp.f32 %v663_v30  ;;  %v1185_v30 = vld [vmem:[#allocation9 + $0x20] sm:$0xff] }
 0xc84   :  { %v2806_v31 = vpop.eup %2805 }
 0xc85   :  { %v667_v34 = vmul.f32 %v2806_v31, %v568_v18 }
 0xce8   :  { %v670_v32 = vpop.permute.xlu1 %669 }
 0xce9   :  { %v672_v33 = vmul.f32 %v2806_v31, %v670_v32 }
 0xceb   :  { %674 = vrot.lane.b32.xlu0 %v672_v33, %s3167_s27  ;;  %v1187_v33 = vld [vmem:[#allocation9 + $0x30] sm:$0xff] }
 0xd5d   :  { %v675_v35 = vpop.permute.xlu0 %674 }
 0xd5e   :  { %v677_v36 = vadd.f32 %v675_v35, %v667_v34  ;;  %v1188_v34 = vld [vmem:[#allocation9 + $0x38] sm:$0xff] }
 0xd5f   :  { %v3481_v35 = vpack.c.bf16 %v1188_v34, %v1187_v33 }
 0xd60   :  { %2807 = vtanh.f32 %v677_v36 }
 0xd6a   :  { %v2808_v37 = vpop.eup %2807 }
 0xd6b   :  { %680 = vrot.lane.b32.xlu1 %v2808_v37, %s3166_s7 }
 0xddd   :  { %v681_v38 = vpop.permute.xlu1 %680 }
 0xdde   :  { %v683_v39 = vmul.f32 %v2806_v31, %v681_v38  ;;  %v1186_v31 = vld [vmem:[#allocation9 + $0x28] sm:$0xff]  ;;  %v1182_v38 = vld [vmem:[#allocation13 + $0x8] sm:$0xff] }
 0xddf   :  { %v3477_v32 = vpack.c.bf16 %v1186_v31, %v1185_v30 }
 0xde0   :  { %685 = vrot.lane.b32.xlu0 %v683_v39, %s3167_s27 }
 0xe52   :  { %v686_v40 = vpop.permute.xlu0 %685 }
 0xe53   :  { %689 = vst.msk [vmem:[#allocation2 + $0x20] sm:$0xff] %vm146_vm1, %v686_v40  ;;  %2486 = vmatmul.mubr.msk.f32.vlgmr.msra.gmra.mrb[6].mxu1 %vm146_vm1, %v686_v40  ;;  %v1180_v40 = vld [vmem:[#allocation12 + $0x8] sm:$0xff] }
 0xe54   :  { %2682 = vmatpush3.bf16.msra.mxu1 %v3369_v5  ;;  %2507 = vmatprep.mubr.msk.f32.mxu1 %vm3164_vm0, %v3165_v1 }
 0xe55   :  { %2683 = vmatprep.subr.bf16.mxu1 %v3163_v0 }
 0xe58   :  { %2685 = vmatpush3.bf16.msra.mxu1 %v3372_v7 }
 0xe59   :  { %2694 = vmatprep.subr.bf16.mxu1 %v3163_v0 }
 0xe5a   :  { %v1027_v6 = vld [vmem:[#allocation2 + $0x20] sm:$0xff] }
 0xf26   :  { %v764_v42 = vpop.f32.mrb[6].mxu1 }
 0xf27   :  { %v768_v43 = vadd.f32 %v764_v42, %v691_v41  ;;  %v2487_v44 = vpop.f32.mrb[7].mxu1 }
 0xf28   :  { %v3503_v44 = vld [vmem:[#allocation10] ss:$0 sm:$0xff] }
 0xf29   :  { %2809 = vtanh.f32 %v768_v43  ;;  %v2279_v46 = vmul.f32 -1.442695, %v768_v43 }
 0xf2b   :  { %2811 = vpow2.f32 %v2279_v46 }
 0xf33   :  { %v2810_v45 = vpop.eup %2809 }
 0xf34   :  { %778 = vrot.lane.b32.xlu1 %v2810_v45, %s3166_s7 }
 0xf35   :  { %v2812_v5 = vpop.eup %2811 }
 0xf36   :  { %v772_v47 = vadd.f32 1.0, %v2812_v5 }
 0xf38   :  { %2813 = vrcp.f32 %v772_v47 }
 0xf42   :  { %v2814_v48 = vpop.eup %2813 }
 0xf43   :  { %v776_v7 = vmul.f32 %v2814_v48, %v677_v36 }
 0xfa6   :  { %v779_v49 = vpop.permute.xlu1 %778 }
 0xfa7   :  { %v781_v50 = vmul.f32 %v2814_v48, %v779_v49 }
 0xfa9   :  { %783 = vrot.lane.b32.xlu0 %v781_v50, %s3167_s27 }
0x101b   :  { %v784_v51 = vpop.permute.xlu0 %783 }
0x101c   :  { %v786_v52 = vadd.f32 %v784_v51, %v776_v7 }
0x101e   :  { %2815 = vtanh.f32 %v786_v52 }
0x1028   :  { %v2816_v56 = vpop.eup %2815 }
0x1029   :  { %789 = vrot.lane.b32.xlu1 %v2816_v56, %s3166_s7  ;;  %v909_v56 = vld [vmem:[#allocation4 + $0x38] sm:$0xff] }
0x109b   :  { %v790_v57 = vpop.permute.xlu1 %789 }
0x109c   :  { %v792_v58 = vmul.f32 %v2814_v48, %v790_v57 }
0x109e   :  { %794 = vrot.lane.b32.xlu0 %v792_v58, %s3167_s27 }
0x1110   :  { %v795_v62 = vpop.permute.xlu0 %794 }
0x1111   :  { %798 = vst.msk [vmem:[#allocation2 + $0x28] sm:$0xff] %vm146_vm1, %v795_v62  ;;  %2497 = vmatmul.mubr.msk.f32.vlgmr.msra.gmra.mrb[4].mxu0 %vm146_vm1, %v795_v62 }
0x1112   :  { %2689 = vmatpush3.bf16.msra.mxu0 %v2686_v55  ;;  %2518 = vmatprep.mubr.msk.f32.mxu0 %vm146_vm1, %v1023_v63 }
0x1113   :  { %2691 = vmatprep.subr.bf16.mxu0 %v2690_v61 }
0x1116   :  { %2693 = vmatpush3.bf16.msra.mxu0 %v2690_v61 }
0x1117   :  { %2706 = vmatprep.subr.bf16.mxu0 %v3163_v0 }
0x1118   :  { %v1028_v8 = vld [vmem:[#allocation2 + $0x28] sm:$0xff] }
0x1119   :  { %2519 = vmatmul.mubr.msk.f32.vlgmr.msra.gmra.mrb[6].mxu0 %vm146_vm1, %v1024_v2 }
0x111a   :  { %2521 = vmatprep.mubr.msk.f32.mxu0 %vm146_vm1, %v1025_v3  ;;  %2708 = vmatpush3.bf16.msra.mxu0 %v3477_v32 }
0x111b   :  { %2709 = vmatprep.subr.bf16.mxu0 %v3163_v0 }
0x111d   :  { %2522 = vmatmul.mubr.msk.f32.gmra.mrb[8].mxu0 %vm146_vm1, %v1026_v4 }
0x111e   :  { %2524 = vmatprep.mubr.msk.f32.mxu0 %vm146_vm1, %v1027_v6  ;;  %2711 = vmatpush3.bf16.msra.mxu0 %v3481_v35 }
0x111f   :  { %2718 = vmatprep.subr.bf16.mxu0 %v3163_v0 }
0x1121   :  { %2525 = vmatmul.mubr.msk.f32.gmra.mrb[10].mxu0 %vm146_vm1, %v1028_v8 }
0x11e4   :  { %v873_v10 = vpop.f32.mrb[4].mxu0 }
0x11e5   :  { %v877_v11 = vadd.f32 %v873_v10, %v800_v9  ;;  %v2498_v12 = vpop.f32.mrb[5].mxu0 }
0x11e7   :  { %2817 = vtanh.f32 %v877_v11  ;;  %v2281_v20 = vmul.f32 -1.442695, %v877_v11 }
0x11e9   :  { %2819 = vpow2.f32 %v2281_v20 }
0x11ec   :  { %v3461_v13 = vpop.f32.mrb[6].mxu0 }
0x11ed   :  { %v1132_v14 = vpop.f32.mrb[7].mxu0 }
0x11ee   :  { %v1133_v45 = vadd.f32 %v3503_v44, %v1132_v14 }
0x11f0   :  { %v3463_v15 = vpop.f32.mrb[8].mxu0 }
0x11f1   :  { %v2818_v16 = vpop.eup %2817  ;;  %v3465_v17 = vpop.f32.mrb[9].mxu0 }
0x11f2   :  { %887 = vrot.lane.b32.xlu1 %v2818_v16, %s3166_s7 }
0x11f3   :  { %v2820_v21 = vpop.eup %2819 }
0x11f4   :  { %v3468_v18 = vpop.f32.mrb[10].mxu0  ;;  %v881_v22 = vadd.f32 1.0, %v2820_v21 }
0x11f5   :  { %v3470_v19 = vpop.f32.mrb[11].mxu0 }
0x11f6   :  { %2821 = vrcp.f32 %v881_v22  ;;  %v1138_v22 = vadd.f32 %v3461_v13, %v3503_v44 }
0x1200   :  { %v2822_v23 = vpop.eup %2821 }
0x1201   :  { %v885_v26 = vmul.f32 %v2822_v23, %v786_v52 }
0x1264   :  { %v888_v24 = vpop.permute.xlu1 %887 }
0x1265   :  { %v890_v25 = vmul.f32 %v2822_v23, %v888_v24 }
0x1267   :  { %892 = vrot.lane.b32.xlu0 %v890_v25, %s3167_s27 }
0x12d9   :  { %v893_v27 = vpop.permute.xlu0 %892 }
0x12da   :  { %v3473_v28 = vadd.f32 %v893_v27, %v885_v26 }
0x12dc   :  { %2823 = vtanh.f32 %v3473_v28 }
0x12e6   :  { %v2824_v29 = vpop.eup %2823 }
0x12e7   :  { %898 = vrot.lane.b32.xlu1 %v2824_v29, %s3166_s7 }
0x1359   :  { %v899_v36 = vpop.permute.xlu1 %898 }
0x135a   :  { %v901_v37 = vmul.f32 %v2822_v23, %v899_v36 }
0x135c   :  { %903 = vrot.lane.b32.xlu0 %v901_v37, %s3167_s27 }
0x1360   :  { %1271 = vrot.lane.b32.xlu0 %v1182_v38, %s3167_s27 }
0x13ce   :  { %v904_v39 = vpop.permute.xlu0 %903 }
0x13cf   :  { %907 = vst.msk [vmem:[#allocation2 + $0x30] sm:$0xff] %vm146_vm1, %v904_v39  ;;  %2508 = vmatmul.mubr.msk.f32.vlgmr.msra.gmra.mrb[8].mxu1 %vm146_vm1, %v904_v39 }
0x13d0   :  { %2696 = vmatpush3.bf16.msra.mxu1 %v3477_v32  ;;  %2538 = vmatprep.mubr.msk.f32.mxu1 %vm3164_vm0, %v3165_v1 }
0x13d1   :  { %2697 = vmatprep.subr.bf16.mxu1 %v3163_v0 }
0x13d2   :  { %v1272_v54 = vpop.permute.xlu0 %1271 }
0x13d4   :  { %2699 = vmatpush3.bf16.msra.mxu1 %v3481_v35 }
0x13d5   :  { %2700 = vmatprep.subr.bf16.mxu1 %v3163_v0 }
0x13d6   :  { %v1029_v41 = vld [vmem:[#allocation2 + $0x30] sm:$0xff] }
0x13d7   :  { %2539 = vmatmul.mubr.msk.f32.vlgmr.msra.gmra.mrb[10].mxu1 %vm146_vm1, %v1180_v40  ;;  %2527 = vmatprep.mubr.msk.f32.mxu0 %vm146_vm1, %v1029_v41 }
0x13d8   :  { %2702 = vmatpush3.bf16.msra.mxu1 %v3477_v32  ;;  %2549 = vmatprep.mubr.msk.f32.mxu1 %vm3164_vm0, %v3165_v1 }
0x13d9   :  { %2703 = vmatprep.subr.bf16.mxu1 %v3163_v0 }
0x13dc   :  { %2705 = vmatpush3.bf16.msra.mxu1 %v3481_v35 }
0x13dd   :  { %2712 = vmatprep.subr.bf16.mxu1 %v3163_v0 }
0x14a2   :  { %v982_v42 = vpop.f32.mrb[8].mxu1 }
0x14a3   :  { %v2509_v43 = vpop.f32.mrb[9].mxu1  ;;  %v986_v59 = vadd.f32 %v982_v42, %v909_v56 }
0x14a5   :  { %v2283_v62 = vmul.f32 -1.442695, %v986_v59 }
0x14aa   :  { %v1258_v46 = vpop.f32.mrb[10].mxu1 }
0x14ab   :  { %v1262_v5 = vadd.f32 %v1258_v46, %v1133_v45  ;;  %v2540_v47 = vpop.f32.mrb[11].mxu1  ;;  %v1143_v46 = vadd.f32 %v3503_v44, %v3465_v17 }
0x14ad   :  { %2825 = vtanh.f32 %v1262_v5  ;;  %v2294_v49 = vmul.f32 -1.442695, %v1262_v5 }
0x14af   :  { %2827 = vpow2.f32 %v2294_v49 }
0x14b7   :  { %v2826_v48 = vpop.eup %2825 }
0x14b8   :  { %1276 = vrot.lane.b32.xlu1 %v2826_v48, %s3166_s7 }
0x14b9   :  { %v2828_v50 = vpop.eup %2827 }
0x14ba   :  { %v1266_v7 = vadd.f32 1.0, %v2828_v50 }
0x14bc   :  { %2829 = vrcp.f32 %v1266_v7 }
0x14c6   :  { %v2830_v51 = vpop.eup %2829 }
0x14c7   :  { %v1274_v55 = vmul.f32 %v2830_v51, %v1272_v54 }
0x152a   :  { %v1277_v52 = vpop.permute.xlu1 %1276 }
0x152b   :  { %v1279_v53 = vmul.f32 %v2830_v51, %v1277_v52 }
0x152d   :  { %1281 = vrot.lane.b32.xlu1 %v1279_v53, %s3167_s27 }
0x159f   :  { %v1282_v57 = vpop.permute.xlu1 %1281 }
0x15a0   :  { %v1284_v58 = vadd.f32 %v1282_v57, %v1274_v55 }
0x15a2   :  { %2831 = vtanh.f32 %v1284_v58 }
0x15a3   :  { %2833 = vtanh.f32 %v986_v59 }
0x15a4   :  { %2835 = vpow2.f32 %v2283_v62 }
0x15ac   :  { %v2832_v60 = vpop.eup %2831 }
0x15ad   :  { %1287 = vrot.lane.b32.xlu0 %v2832_v60, %s3166_s7  ;;  %v2834_v61 = vpop.eup %2833 }
0x15ae   :  { %v2836_v63 = vpop.eup %2835 }
0x15af   :  { %v990_v2 = vadd.f32 1.0, %v2836_v63 }
0x15b1   :  { %996 = vrot.lane.b32.xlu0 %v2834_v61, %s3166_s7  ;;  %2837 = vrcp.f32 %v990_v2  ;;  %v1148_v61 = vadd.f32 %v3463_v15, %v3503_v44 }
0x15bb   :  { %v2838_v6 = vpop.eup %2837 }
0x15bc   :  { %v994_v11 = vmul.f32 %v2838_v6, %v3473_v28 }
0x161f   :  { %v1288_v3 = vpop.permute.xlu0 %1287 }
0x1620   :  { %v1290_v4 = vmul.f32 %v2830_v51, %v1288_v3 }
0x1622   :  { %1292 = vrot.lane.b32.xlu1 %v1290_v4, %s3167_s27 }
0x1623   :  { %v997_v8 = vpop.permute.xlu0 %996 }
0x1624   :  { %v999_v9 = vmul.f32 %v2838_v6, %v997_v8 }
0x1626   :  { %1001 = vrot.lane.b32.xlu0 %v999_v9, %s3167_s27 }
0x1694   :  { %v1293_v10 = vpop.permute.xlu1 %1292 }
0x1695   :  { %1295 = vst.msk [vmem:[#allocation2] sm:$0xff] %vm146_vm1, %v1293_v10  ;;  %2550 = vmatmul.mubr.msk.f32.vlgmr.msra.gmra.mrb[12].mxu1 %vm146_vm1, %v1293_v10 }
0x1696   :  { %2714 = vmatpush3.bf16.msra.mxu1 %v3477_v32  ;;  %2571 = vmatprep.mubr.msk.f32.mxu1 %vm3164_vm0, %v3165_v1 }
0x1697   :  { %2715 = vmatprep.subr.bf16.mxu1 %v3163_v0 }
0x1698   :  { %v1002_v12 = vpop.permute.xlu0 %1001 }
0x1699   :  { %v3519_v14 = vadd.f32 %v1002_v12, %v994_v11 }
0x169a   :  { %2717 = vmatpush3.bf16.msra.mxu1 %v3481_v35 }
0x169b   :  { %2839 = vtanh.f32 %v3519_v14  ;;  %2724 = vmatprep.subr.bf16.mxu1 %v3163_v0 }
0x16a5   :  { %v2840_v16 = vpop.eup %2839 }
0x16a6   :  { %1007 = vrot.lane.b32.xlu0 %v2840_v16, %s3166_s7 }
0x1718   :  { %v1008_v20 = vpop.permute.xlu0 %1007 }
0x1719   :  { %v1010_v21 = vmul.f32 %v2838_v6, %v1008_v20 }
0x171b   :  { %1012 = vrot.lane.b32.xlu0 %v1010_v21, %s3167_s27 }
0x1768   :  { %v1370_v23 = vpop.f32.mrb[12].mxu1 }
0x1769   :  { %v1374_v24 = vadd.f32 %v1370_v23, %v1138_v22  ;;  %v2551_v25 = vpop.f32.mrb[13].mxu1 }
0x176b   :  { %2841 = vtanh.f32 %v1374_v24  ;;  %v2296_v29 = vmul.f32 -1.442695, %v1374_v24  ;;  %v1153_v24 = vadd.f32 %v3503_v44, %v3470_v19 }
0x176d   :  { %2843 = vpow2.f32 %v2296_v29 }
0x1775   :  { %v2842_v26 = vpop.eup %2841 }
0x1776   :  { %1384 = vrot.lane.b32.xlu1 %v2842_v26, %s3166_s7 }
0x1777   :  { %v2844_v13 = vpop.eup %2843 }
0x1778   :  { %v1378_v30 = vadd.f32 1.0, %v2844_v13 }
0x177a   :  { %2845 = vrcp.f32 %v1378_v30 }
0x1784   :  { %v2846_v31 = vpop.eup %2845 }
0x1785   :  { %v1382_v36 = vmul.f32 %v2846_v31, %v1284_v58 }
0x178d   :  { %v1013_v27 = vpop.permute.xlu0 %1012 }
0x178e   :  { %1016 = vst.msk [vmem:[#allocation2 + $0x38] sm:$0xff] %vm146_vm1, %v1013_v27  ;;  %1017 = vst.msk [vmem:[#allocation19] sm:$0xff] %vm146_vm1, %v1013_v27 }
0x1795   :  { %v1030_v28 = vld [vmem:[#allocation2 + $0x38] sm:$0xff] }
0x1796   :  { %2528 = vmatmul.mubr.msk.f32.gmra.mrb[12].mxu0 %vm146_vm1, %v1030_v28 }
0x1797   :  { %2560 = vmatprep.mubr.msk.f32.mxu0 %vm3164_vm0, %v3165_v1 }
0x17e8   :  { %v1385_v33 = vpop.permute.xlu1 %1384 }
0x17e9   :  { %v1387_v34 = vmul.f32 %v2846_v31, %v1385_v33 }
0x17eb   :  { %1389 = vrot.lane.b32.xlu1 %v1387_v34, %s3167_s27 }
0x185d   :  { %v1390_v37 = vpop.permute.xlu1 %1389 }
0x185e   :  { %v1392_v38 = vadd.f32 %v1390_v37, %v1382_v36 }
0x1860   :  { %2847 = vtanh.f32 %v1392_v38 }
0x1869   :  { %v3535_v39 = vpop.f32.mrb[12].mxu0 }
0x186a   :  { %v2848_v40 = vpop.eup %2847  ;;  %v3537_v41 = vpop.f32.mrb[13].mxu0 }
0x186b   :  { %1395 = vrot.lane.b32.xlu1 %v2848_v40, %s3166_s7 }
0x18dd   :  { %v1396_v42 = vpop.permute.xlu1 %1395 }
0x18de   :  { %v1398_v43 = vmul.f32 %v2846_v31, %v1396_v42 }
0x18e0   :  { %1400 = vrot.lane.b32.xlu1 %v1398_v43, %s3167_s27 }
0x1952   :  { %v1401_v45 = vpop.permute.xlu1 %1400 }
0x1953   :  { %1403 = vst.msk [vmem:[#allocation2 + $0x8] sm:$0xff] %vm146_vm1, %v1401_v45  ;;  %2561 = vmatmul.mubr.msk.f32.vlgmr.msra.gmra.mrb[14].mxu0 %vm146_vm1, %v1401_v45  ;;  %v1158_v45 = vadd.f32 %v3468_v18, %v3503_v44 }
0x1954   :  { %2720 = vmatpush3.bf16.msra.mxu0 %v3477_v32  ;;  %2582 = vmatprep.mubr.msk.f32.mxu0 %vm3164_vm0, %v3165_v1 }
0x1955   :  { %2721 = vmatprep.subr.bf16.mxu0 %v3163_v0 }
0x1958   :  { %2723 = vmatpush3.bf16.msra.mxu0 %v3481_v35 }
0x1959   :  { %2730 = vmatprep.subr.bf16.mxu0 %v3163_v0 }
0x1a26   :  { %v1478_v5 = vpop.f32.mrb[14].mxu0 }
0x1a27   :  { %v1482_v47 = vadd.f32 %v1478_v5, %v1143_v46  ;;  %v2562_v48 = vpop.f32.mrb[15].mxu0 }
0x1a29   :  { %2849 = vtanh.f32 %v1482_v47  ;;  %v2298_v50 = vmul.f32 -1.442695, %v1482_v47 }
0x1a2b   :  { %2851 = vpow2.f32 %v2298_v50 }
0x1a33   :  { %v2850_v49 = vpop.eup %2849 }
0x1a34   :  { %1492 = vrot.lane.b32.xlu0 %v2850_v49, %s3166_s7 }
0x1a35   :  { %v2852_v7 = vpop.eup %2851 }
0x1a36   :  { %v1486_v51 = vadd.f32 1.0, %v2852_v7 }
0x1a38   :  { %2853 = vrcp.f32 %v1486_v51 }
0x1a42   :  { %v2854_v52 = vpop.eup %2853 }
0x1a43   :  { %v1490_v55 = vmul.f32 %v2854_v52, %v1392_v38 }
0x1aa6   :  { %v1493_v53 = vpop.permute.xlu0 %1492 }
0x1aa7   :  { %v1495_v54 = vmul.f32 %v2854_v52, %v1493_v53  ;;  %v2069_v53 = vld [vmem:[#allocation15 + $0x8] sm:$0xff] }
0x1aa9   :  { %1497 = vrot.lane.b32.xlu1 %v1495_v54, %s3167_s27 }
0x1b1b   :  { %v1498_v56 = vpop.permute.xlu1 %1497 }
0x1b1c   :  { %v1500_v17 = vadd.f32 %v1498_v56, %v1490_v55 }
0x1b1e   :  { %2855 = vtanh.f32 %v1500_v17 }
0x1b28   :  { %v2856_v57 = vpop.eup %2855 }
0x1b29   :  { %1503 = vrot.lane.b32.xlu0 %v2856_v57, %s3166_s7  ;;  %v2070_v57 = vld [vmem:[#allocation15 + $0x10] sm:$0xff] }
0x1b9b   :  { %v1504_v58 = vpop.permute.xlu0 %1503 }
0x1b9c   :  { %v1506_v59 = vmul.f32 %v2854_v52, %v1504_v58  ;;  %v2068_v52 = vld [vmem:[#allocation15] sm:$0xff]  ;;  %v2071_v58 = vld [vmem:[#allocation15 + $0x18] sm:$0xff] }
0x1b9d   :  { %v2742_v54 = vpack.c.bf16 %v2069_v53, %v2068_v52 }
0x1b9e   :  { %1508 = vrot.lane.b32.xlu1 %v1506_v59, %s3167_s27  ;;  %v2746_v59 = vpack.c.bf16 %v2071_v58, %v2070_v57 }
0x1c10   :  { %v1509_v60 = vpop.permute.xlu1 %1508 }
0x1c11   :  { %1511 = vst.msk [vmem:[#allocation2 + $0x10] sm:$0xff] %vm146_vm1, %v1509_v60  ;;  %2572 = vmatmul.mubr.msk.f32.vlgmr.msra.gmra.mrb[14].mxu1 %vm146_vm1, %v1509_v60 }
0x1c12   :  { %2726 = vmatpush3.bf16.msra.mxu1 %v3477_v32  ;;  %2593 = vmatprep.mubr.msk.f32.mxu1 %vm3164_vm0, %v3165_v1 }
0x1c13   :  { %2727 = vmatprep.subr.bf16.mxu1 %v3163_v0 }
0x1c16   :  { %2729 = vmatpush3.bf16.msra.mxu1 %v3481_v35 }
0x1c17   :  { %2736 = vmatprep.subr.bf16.mxu1 %v3163_v0 }
0x1ce4   :  { %v1586_v62 = vpop.f32.mrb[14].mxu1 }
0x1ce5   :  { %v1590_v63 = vadd.f32 %v1586_v62, %v1148_v61  ;;  %v2573_v2 = vpop.f32.mrb[15].mxu1  ;;  %v2060_v61 = vld [vmem:[#allocation2] sm:$0xff]  ;;  %v2061_v62 = vld [vmem:[#allocation2 + $0x8] sm:$0xff] }
0x1ce7   :  { %2857 = vtanh.f32 %v1590_v63  ;;  %v2300_v4 = vmul.f32 -1.442695, %v1590_v63  ;;  %v2062_v63 = vld [vmem:[#allocation2 + $0x10] sm:$0xff] }
0x1ce9   :  { %2859 = vpow2.f32 %v2300_v4 }
0x1cf1   :  { %v2858_v3 = vpop.eup %2857 }
0x1cf2   :  { %1600 = vrot.lane.b32.xlu0 %v2858_v3, %s3166_s7 }
0x1cf3   :  { %v2860_v6 = vpop.eup %2859 }
0x1cf4   :  { %v1594_v8 = vadd.f32 1.0, %v2860_v6  ;;  %v1163_v6 = vadd.f32 %v3503_v44, %v3537_v41 }
0x1cf6   :  { %2861 = vrcp.f32 %v1594_v8 }
0x1d00   :  { %v2862_v9 = vpop.eup %2861 }
0x1d01   :  { %v1598_v12 = vmul.f32 %v2862_v9, %v1500_v17 }
0x1d64   :  { %v1601_v10 = vpop.permute.xlu0 %1600 }
0x1d65   :  { %v1603_v11 = vmul.f32 %v2862_v9, %v1601_v10 }
0x1d67   :  { %1605 = vrot.lane.b32.xlu1 %v1603_v11, %s3167_s27  ;;  %v3608_v11 = vld [vmem:[#allocation16] ss:$0 sm:$0xff] }
0x1dd9   :  { %v1606_v16 = vpop.permute.xlu1 %1605 }
0x1dda   :  { %v1608_v15 = vadd.f32 %v1606_v16, %v1598_v12 }
0x1ddc   :  { %2863 = vtanh.f32 %v1608_v15 }
0x1de6   :  { %v2864_v20 = vpop.eup %2863 }
0x1de7   :  { %1611 = vrot.lane.b32.xlu0 %v2864_v20, %s3166_s7 }
0x1e59   :  { %v1612_v21 = vpop.permute.xlu0 %1611 }
0x1e5a   :  { %v1614_v22 = vmul.f32 %v2862_v9, %v1612_v21 }
0x1e5c   :  { %1616 = vrot.lane.b32.xlu1 %v1614_v22, %s3167_s27 }
0x1ece   :  { %v1617_v23 = vpop.permute.xlu1 %1616 }
0x1ecf   :  { %1619 = vst.msk [vmem:[#allocation2 + $0x18] sm:$0xff] %vm146_vm1, %v1617_v23  ;;  %2583 = vmatmul.mubr.msk.f32.vlgmr.msra.gmra.mrb[16].mxu0 %vm146_vm1, %v1617_v23 }
0x1ed0   :  { %2732 = vmatpush3.bf16.msra.mxu0 %v3477_v32  ;;  %2604 = vmatprep.mubr.msk.f32.mxu0 %vm3164_vm0, %v3165_v1 }
0x1ed1   :  { %2733 = vmatprep.subr.bf16.mxu0 %v3163_v0 }
0x1ed4   :  { %2735 = vmatpush3.bf16.msra.mxu0 %v3481_v35 }
0x1ed5   :  { %2743 = vmatprep.subr.bf16.mxu0 %v2742_v54 }
0x1ed6   :  { %v2063_v2 = vld [vmem:[#allocation2 + $0x18] sm:$0xff] }
0x1fa2   :  { %v1694_v25 = vpop.f32.mrb[16].mxu0 }
0x1fa3   :  { %v1698_v26 = vadd.f32 %v1694_v25, %v1153_v24  ;;  %v2584_v27 = vpop.f32.mrb[17].mxu0 }
0x1fa5   :  { %2865 = vtanh.f32 %v1698_v26  ;;  %v2302_v29 = vmul.f32 -1.442695, %v1698_v26 }
0x1fa7   :  { %2867 = vpow2.f32 %v2302_v29 }
0x1faf   :  { %v2866_v28 = vpop.eup %2865 }
0x1fb0   :  { %1708 = vrot.lane.b32.xlu0 %v2866_v28, %s3166_s7 }
0x1fb1   :  { %v2868_v13 = vpop.eup %2867 }
0x1fb2   :  { %v1702_v30 = vadd.f32 1.0, %v2868_v13 }
0x1fb4   :  { %2869 = vrcp.f32 %v1702_v30 }
0x1fbe   :  { %v2870_v31 = vpop.eup %2869 }
0x1fbf   :  { %v1706_v36 = vmul.f32 %v2870_v31, %v1608_v15 }
0x2022   :  { %v1709_v33 = vpop.permute.xlu0 %1708 }
0x2023   :  { %v1711_v34 = vmul.f32 %v2870_v31, %v1709_v33 }
0x2025   :  { %1713 = vrot.lane.b32.xlu1 %v1711_v34, %s3167_s27 }
0x2097   :  { %v1714_v37 = vpop.permute.xlu1 %1713 }
0x2098   :  { %v1716_v19 = vadd.f32 %v1714_v37, %v1706_v36 }
0x209a   :  { %2871 = vtanh.f32 %v1716_v19 }
0x20a4   :  { %v2872_v38 = vpop.eup %2871 }
0x20a5   :  { %1719 = vrot.lane.b32.xlu0 %v2872_v38, %s3166_s7 }
0x2117   :  { %v1720_v40 = vpop.permute.xlu0 %1719 }
0x2118   :  { %v1722_v42 = vmul.f32 %v2870_v31, %v1720_v40 }
0x211a   :  { %1724 = vrot.lane.b32.xlu1 %v1722_v42, %s3167_s27 }
0x218c   :  { %v1725_v43 = vpop.permute.xlu1 %1724 }
0x218d   :  { %1727 = vst.msk [vmem:[#allocation2 + $0x20] sm:$0xff] %vm146_vm1, %v1725_v43  ;;  %2594 = vmatmul.mubr.msk.f32.vlgmr.msra.gmra.mrb[16].mxu1 %vm146_vm1, %v1725_v43 }
0x218e   :  { %2738 = vmatpush3.bf16.msra.mxu1 %v3477_v32  ;;  %2615 = vmatprep.mubr.msk.f32.mxu1 %vm3164_vm0, %v3165_v1 }
0x218f   :  { %2739 = vmatprep.subr.bf16.mxu1 %v3163_v0 }
0x2192   :  { %2741 = vmatpush3.bf16.msra.mxu1 %v3481_v35 }
0x2194   :  { %v2064_v3 = vld [vmem:[#allocation2 + $0x20] sm:$0xff] }
0x2260   :  { %v1802_v46 = vpop.f32.mrb[16].mxu1 }
0x2261   :  { %v1806_v5 = vadd.f32 %v1802_v46, %v1158_v45  ;;  %v2595_v47 = vpop.f32.mrb[17].mxu1  ;;  %v1168_v46 = vadd.f32 %v3535_v39, %v3503_v44 }
0x2263   :  { %2873 = vtanh.f32 %v1806_v5  ;;  %v2304_v49 = vmul.f32 -1.442695, %v1806_v5 }
0x2265   :  { %2875 = vpow2.f32 %v2304_v49 }
0x226d   :  { %v2874_v48 = vpop.eup %2873 }
0x226e   :  { %1816 = vrot.lane.b32.xlu0 %v2874_v48, %s3166_s7 }
0x226f   :  { %v2876_v32 = vpop.eup %2875 }
0x2270   :  { %v1810_v50 = vadd.f32 1.0, %v2876_v32 }
0x2272   :  { %2877 = vrcp.f32 %v1810_v50 }
0x227c   :  { %v2878_v1 = vpop.eup %2877 }
0x227d   :  { %v1814_v35 = vmul.f32 %v2878_v1, %v1716_v19 }
0x22e0   :  { %v1817_v7 = vpop.permute.xlu0 %1816 }
0x22e1   :  { %v1819_v0 = vmul.f32 %v2878_v1, %v1817_v7 }
0x22e3   :  { %1821 = vrot.lane.b32.xlu1 %v1819_v0, %s3167_s27 }
0x2355   :  { %v1822_v51 = vpop.permute.xlu1 %1821 }
0x2356   :  { %v3593_v18 = vadd.f32 %v1822_v51, %v1814_v35 }
0x2358   :  { %2879 = vtanh.f32 %v3593_v18 }
0x2362   :  { %v2880_v55 = vpop.eup %2879 }
0x2363   :  { %1827 = vrot.lane.b32.xlu0 %v2880_v55, %s3166_s7 }
0x23d5   :  { %v1828_v56 = vpop.permute.xlu0 %1827 }
0x23d6   :  { %v1830_v17 = vmul.f32 %v2878_v1, %v1828_v56 }
0x23d8   :  { %1832 = vrot.lane.b32.xlu1 %v1830_v17, %s3167_s27 }
0x244a   :  { %v1833_v60 = vpop.permute.xlu1 %1832 }
0x244b   :  { %1835 = vst.msk [vmem:[#allocation2 + $0x28] sm:$0xff] %vm146_vm1, %v1833_v60  ;;  %2605 = vmatmul.mubr.msk.f32.vlgmr.msra.gmra.mrb[18].mxu0 %vm146_vm1, %v1833_v60 }
0x244c   :  { %2745 = vmatpush3.bf16.msra.mxu0 %v2742_v54  ;;  %2626 = vmatprep.mubr.msk.f32.mxu0 %vm146_vm1, %v2060_v61 }
0x244d   :  { %2747 = vmatprep.subr.bf16.mxu0 %v2746_v59 }
0x2450   :  { %2749 = vmatpush3.bf16.msra.mxu0 %v2746_v59 }
0x2452   :  { %v2065_v4 = vld [vmem:[#allocation2 + $0x28] sm:$0xff] }
0x2453   :  { %2627 = vmatmul.mubr.msk.f32.vlgmr.msra.gmra.mrb[20].mxu0 %vm146_vm1, %v2061_v62 }
0x2454   :  { %2629 = vmatprep.mubr.msk.f32.mxu0 %vm146_vm1, %v2062_v63 }
0x2457   :  { %2630 = vmatmul.mubr.msk.f32.gmra.mrb[22].mxu0 %vm146_vm1, %v2063_v2 }
0x2458   :  { %2632 = vmatprep.mubr.msk.f32.mxu0 %vm146_vm1, %v2064_v3 }
0x245b   :  { %2633 = vmatmul.mubr.msk.f32.gmra.mrb[24].mxu0 %vm146_vm1, %v2065_v4 }
0x251e   :  { %v1910_v8 = vpop.f32.mrb[18].mxu0 }
0x251f   :  { %v1914_v9 = vadd.f32 %v1910_v8, %v1163_v6  ;;  %v2606_v10 = vpop.f32.mrb[19].mxu0 }
0x2521   :  { %2881 = vtanh.f32 %v1914_v9  ;;  %v2306_v29 = vmul.f32 -1.442695, %v1914_v9 }
0x2523   :  { %2883 = vpow2.f32 %v2306_v29 }
0x2526   :  { %v2628_v12 = vpop.f32.mrb[20].mxu0 }
0x2527   :  { %v2175_v16 = vadd.f32 %v2628_v12, %v3608_v11  ;;  %v2169_v15 = vpop.f32.mrb[21].mxu0 }
0x2528   :  { %v2170_v20 = vadd.f32 %v3608_v11, %v2169_v15 }
0x2529   :  { %2209 = vst [vmem:[#allocation18 + $0x8] sm:$0xff] %v2175_v16 }
0x252a   :  { %2208 = vst [vmem:[#allocation18] sm:$0xff] %v2170_v20  ;;  %v2631_v21 = vpop.f32.mrb[22].mxu0 }
0x252b   :  { %v2882_v22 = vpop.eup %2881  ;;  %v2185_v23 = vadd.f32 %v2631_v21, %v3608_v11  ;;  %v2179_v24 = vpop.f32.mrb[23].mxu0 }
0x252c   :  { %v2180_v41 = vadd.f32 %v3608_v11, %v2179_v24  ;;  %1924 = vrot.lane.b32.xlu0 %v2882_v22, %s3166_s7 }
0x252d   :  { %2211 = vst [vmem:[#allocation18 + $0x18] sm:$0xff] %v2185_v23  ;;  %v2884_v13 = vpop.eup %2883 }
0x252e   :  { %2210 = vst [vmem:[#allocation18 + $0x10] sm:$0xff] %v2180_v41  ;;  %v2634_v25 = vpop.f32.mrb[24].mxu0  ;;  %v1918_v30 = vadd.f32 1.0, %v2884_v13 }
0x252f   :  { %v2195_v26 = vadd.f32 %v2634_v25, %v3608_v11  ;;  %v2189_v27 = vpop.f32.mrb[25].mxu0 }
0x2530   :  { %v2190_v28 = vadd.f32 %v3608_v11, %v2189_v27  ;;  %2885 = vrcp.f32 %v1918_v30 }
0x2531   :  { %2213 = vst [vmem:[#allocation18 + $0x28] sm:$0xff] %v2195_v26 }
0x2532   :  { %2212 = vst [vmem:[#allocation18 + $0x20] sm:$0xff] %v2190_v28 }
0x253a   :  { %v2886_v31 = vpop.eup %2885 }
0x253b   :  { %v1922_v36 = vmul.f32 %v2886_v31, %v3593_v18 }
0x259e   :  { %v1925_v33 = vpop.permute.xlu0 %1924 }
0x259f   :  { %v1927_v34 = vmul.f32 %v2886_v31, %v1925_v33 }
0x25a1   :  { %1929 = vrot.lane.b32.xlu1 %v1927_v34, %s3167_s27 }
0x2613   :  { %v1930_v37 = vpop.permute.xlu1 %1929 }
0x2614   :  { %v1932_v19 = vadd.f32 %v1930_v37, %v1922_v36 }
0x2616   :  { %2887 = vtanh.f32 %v1932_v19 }
0x2620   :  { %v2888_v38 = vpop.eup %2887 }
0x2621   :  { %1935 = vrot.lane.b32.xlu0 %v2888_v38, %s3166_s7 }
0x2693   :  { %v1936_v40 = vpop.permute.xlu0 %1935 }
0x2694   :  { %v1938_v42 = vmul.f32 %v2886_v31, %v1936_v40 }
0x2696   :  { %1940 = vrot.lane.b32.xlu1 %v1938_v42, %s3167_s27 }
0x2708   :  { %v1941_v43 = vpop.permute.xlu1 %1940 }
0x2709   :  { %1943 = vst.msk [vmem:[#allocation2 + $0x30] sm:$0xff] %vm146_vm1, %v1941_v43  ;;  %2616 = vmatmul.mubr.msk.f32.vlgmr.msra.gmra.mrb[18].mxu1 %vm146_vm1, %v1941_v43 }
0x2710   :  { %v2066_v45 = vld [vmem:[#allocation2 + $0x30] sm:$0xff] }
0x2711   :  { %2635 = vmatprep.mubr.msk.f32.mxu0 %vm146_vm1, %v2066_v45 }
0x27dc   :  { %v2018_v5 = vpop.f32.mrb[18].mxu1 }
0x27dd   :  { %v2022_v47 = vadd.f32 %v2018_v5, %v1168_v46  ;;  %v2617_v48 = vpop.f32.mrb[19].mxu1 }
0x27df   :  { %2889 = vtanh.f32 %v2022_v47  ;;  %v2308_v32 = vmul.f32 -1.442695, %v2022_v47 }
0x27e1   :  { %2891 = vpow2.f32 %v2308_v32 }
0x27e9   :  { %v2890_v49 = vpop.eup %2889 }
0x27ea   :  { %2032 = vrot.lane.b32.xlu0 %v2890_v49, %s3166_s7 }
0x27eb   :  { %v2892_v50 = vpop.eup %2891 }
0x27ec   :  { %v2026_v1 = vadd.f32 1.0, %v2892_v50 }
0x27ee   :  { %2893 = vrcp.f32 %v2026_v1 }
0x27f8   :  { %v2894_v7 = vpop.eup %2893 }
0x27f9   :  { %v2030_v51 = vmul.f32 %v2894_v7, %v1932_v19 }
0x285c   :  { %v2033_v0 = vpop.permute.xlu0 %2032 }
0x285d   :  { %v2035_v35 = vmul.f32 %v2894_v7, %v2033_v0 }
0x285f   :  { %2037 = vrot.lane.b32.xlu1 %v2035_v35, %s3167_s27 }
0x28d1   :  { %v2038_v18 = vpop.permute.xlu1 %2037 }
0x28d2   :  { %v2040_v44 = vadd.f32 %v2038_v18, %v2030_v51 }
0x28d4   :  { %2895 = vtanh.f32 %v2040_v44 }
0x28de   :  { %v2896_v39 = vpop.eup %2895 }
0x28df   :  { %2043 = vrot.lane.b32.xlu0 %v2896_v39, %s3166_s7 }
0x28e3   :  { %1019 = vrot.lane.b32.xlu0 %v3519_v14, %s3168_s28 }
0x2951   :  { %v2044_v52 = vpop.permute.xlu0 %2043 }
0x2952   :  { %v2046_v53 = vmul.f32 %v2894_v7, %v2044_v52 }
0x2954   :  { %2048 = vrot.lane.b32.xlu1 %v2046_v53, %s3167_s27 }
0x2955   :  { %v1020_v54 = vpop.permute.xlu0 %1019 }
0x2956   :  { %1022 = vst.msk [vmem:[#allocation21] sm:$0xff] %vm146_vm1, %v1020_v54 }
0x2958   :  { %2055 = vrot.lane.b32.xlu1 %v2040_v44, %s3168_s28 }
0x29c6   :  { %v2049_v55 = vpop.permute.xlu1 %2048 }
0x29c7   :  { %2051 = vst.msk [vmem:[#allocation2 + $0x38] sm:$0xff] %vm146_vm1, %v2049_v55  ;;  %2053 = vst.msk [vmem:[#allocation19 + $0x8] sm:$0xff] %vm146_vm1, %v2049_v55 }
0x29ca   :  { %v2056_v56 = vpop.permute.xlu1 %2055 }
0x29cb   :  { %2059 = vst.msk [vmem:[#allocation21 + $0x8] sm:$0xff] %vm146_vm1, %v2056_v56 }
0x29ce   :  { %v2067_v17 = vld [vmem:[#allocation2 + $0x38] sm:$0xff] }
0x29cf   :  { %2636 = vmatmul.mubr.msk.f32.gmra.mrb[26].mxu0 %vm146_vm1, %v2067_v17 }
0x29d0   :  { %3084 = shalt.err (!%p3081_p12)
}
0x29d1   :  { %s3085_s13 = scalar_lea.hbm %s3692_s9, 256 }
0x29d2   :  { %p3086_p13 = scmp.ne.s32.totalorder %s3692_s9, %s3085_s13  ;;  %p3089_p0 = scmp.lt.u32.totalorder %s3085_s13, %s3692_s9 }
0x29d4   :  { %p3091_p1 = pnand %p3089_p0, %p3086_p13 }
0x29d6   :  { %3094 = shalt.err (!%p3091_p1)
}
0x29d7   :  { %2239 = dma.vmem_to_hbm [thread:$0]  %s2234_s11, 256, %s3692_s9, [#allocation20], %s3155_s25, %s3155_s25, %s3156_s26  }
0x29d8   :  { %s3170_s18 = smov [#allocation21]  }
0x29d9   :  { %s2245_s1 = sshll.u32 %s3170_s18, 4  ;;  %s2246_s1 = int_to_ptr.vmem [resolvable:$true] %s2245_s1 }
0x29da   :  { %s3095_s14 = scalar_lea.vmem %s2246_s1, 256  ;;  %p3100_p3 = scmp.lt.s32.totalorder %s2246_s1, %s2246_s1 }
0x29db   :  { %p3096_p2 = scmp.ne.s32.totalorder %s2246_s1, %s3095_s14  ;;  %p3101_p4 = scmp.lt.s32.totalorder %s3095_s14, %s3095_s14 }
0x29dd   :  { %p3102_p5 = por %p3101_p4, %p3100_p3 }
0x29df   :  { %p3103_p6 = pnand %p3102_p5, %p3096_p2 }
0x29e1   :  { %3106 = shalt.err (!%p3103_p6)
}
0x29e2   :  { %s3107_s22 = scalar_lea.hbm %s3693_s10, 256 }
0x29e3   :  { %p3108_p7 = scmp.ne.s32.totalorder %s3693_s10, %s3107_s22  ;;  %p3111_p8 = scmp.lt.u32.totalorder %s3107_s22, %s3693_s10 }
0x29e5   :  { %p3113_p9 = pnand %p3111_p8, %p3108_p7 }
0x29e7   :  { %3116 = shalt.err (!%p3113_p9)
}
0x29e8   :  { %2251 = dma.vmem_to_hbm [thread:$0]  %s2246_s1, 256, %s3693_s10, [#allocation20], %s3155_s25, %s3155_s25, %s3156_s26  }
0x29e9   :  { %s3171_s7 = smov [#allocation18]  }
0x29ea   :  { %s2221_s27 = sshll.u32 %s3171_s7, 4  ;;  %s2222_s27 = int_to_ptr.vmem [resolvable:$true] %s2221_s27 }
0x29eb   :  { %s3117_s28 = scalar_lea.vmem %s2222_s27, 1024  ;;  %p3122_p11 = scmp.lt.s32.totalorder %s2222_s27, %s2222_s27 }
0x29ec   :  { %p3118_p10 = scmp.ne.s32.totalorder %s2222_s27, %s3117_s28  ;;  %p3123_p12 = scmp.lt.s32.totalorder %s3117_s28, %s3117_s28 }
0x29ee   :  { %p3124_p13 = por %p3123_p12, %p3122_p11 }
0x29f0   :  { %p3125_p0 = pnand %p3124_p13, %p3118_p10 }
0x2aa2   :  { %v2637_v14 = vpop.f32.mrb[26].mxu0 }
0x2aa3   :  { %v2205_v57 = vadd.f32 %v2637_v14, %v3608_v11  ;;  %v2199_v58 = vpop.f32.mrb[27].mxu0 }
0x2aa4   :  { %v2200_v59 = vadd.f32 %v3608_v11, %v2199_v58 }
0x2aa5   :  { %2215 = vst [vmem:[#allocation18 + $0x38] sm:$0xff] %v2205_v57 }
0x2aa6   :  { %2214 = vst [vmem:[#allocation18 + $0x30] sm:$0xff] %v2200_v59 }
0x2aa7   :  { %3128 = shalt.err (!%p3125_p0)
}
0x2aa8   :  { %s3129_s11 = scalar_lea.hbm %s3691_s8, 1024 }
0x2aa9   :  { %p3130_p1 = scmp.ne.s32.totalorder %s3691_s8, %s3129_s11  ;;  %p3133_p2 = scmp.lt.u32.totalorder %s3129_s11, %s3691_s8 }
0x2aab   :  { %p3135_p3 = pnand %p3133_p2, %p3130_p1 }
0x2aad   :  { %3138 = shalt.err (!%p3135_p3)
}
0x2aae   :  { %2227 = dma.vmem_to_hbm [thread:$0]  %s2222_s27, 1024, %s3691_s8, [#allocation6], %s3155_s25, %s3155_s25, %s3156_s26  }
0x2aaf   :  { %3149 = dma.done.wait [#allocation6], 1024  }
0x2ab0   :  { %3150 = vsyncadd [#allocation6], 4294966272 }
0x2ab1   :  { %3151 = dma.done.wait [#allocation20], 512  }
0x2ab2   :  { %3152 = vsyncadd [#allocation20], 4294966784 }
0x2ab3   :  { %2261 = vsyncpa [#allocation5], 1 }
0x2ab4   :  { %2262 = vsyncpa [#allocation8], 1 }
0x2ab5   :  { %2263 = vsyncpa [#allocation11], 1 }
0x2ab6   :  { %2264 = vsyncpa [#allocation14], 1 }
0x2ab7   :  { %2265 = vsyncpa [#allocation17], 1 }
0x2ab8   :  { %2266 = vsyncpa [#allocation6], 1 }
0x2ab9   :  { %2267 = vsyncpa [#allocation20], 1 }

</bundles_post_ra>
